<compile_context>
chip_gen: v5e
topology: v5e:2x2
jax: 0.10.0
libtpu: 0.0.40
codegen_flags: <defaults>
</compile_context>

<pallas_src>
import jax
import jax.numpy as jnp
from jax.experimental import pallas as pl
from jax.experimental.pallas import tpu as pltpu


def _dnorm_kernel(x_ref, o_ref):
    """One block: full D0 and D2 axes, one tile of D1 and D3."""
    x = x_ref[...]                                        # (D0, t1, D2, t3), input dtype
    # Max along the softmax axis is exact in the input dtype; upcast only the
    # small reduced tensor and fuse the upcast of x into the exp expression,
    # avoiding an extra block-sized f32 temporary.
    m = jnp.max(x, axis=0, keepdims=True).astype(jnp.float32)
    e = jnp.exp(x.astype(jnp.float32) - m)

    # Softmax along axis 0: exact reciprocal of the reduced sum, one multiply.
    inv_s0 = pl.reciprocal(jnp.sum(e, axis=0, keepdims=True), approx=False)
    y = e * inv_s0

    # Renormalize along axis 2 (sum over dim2, keepdim=True) the same way.
    inv_s2 = pl.reciprocal(jnp.sum(y, axis=2, keepdims=True), approx=False)
    o_ref[...] = (y * inv_s2).astype(o_ref.dtype)


def _largest_divisor_leq(n, cap):
    cap = max(1, min(n, int(cap)))
    for c in range(cap, 0, -1):
        if n % c == 0:
            return c
    return 1


def _vmem_capacity_bytes():
    try:
        return int(pltpu.get_tpu_info().vmem_capacity_bytes)
    except Exception:
        return 64 << 20  # conservative (v7x per-core) fallback


def dnorm(attn, *, dim1=0, dim2=2, block_budget_bytes=None):
    """Pallas implementation of DNorm.forward for the default dims (0, 2).

    block_budget_bytes is the per-block budget measured on the f32 working
    set (the in-kernel temporaries), not on the input dtype.
    """
    if dim1 != 0 or dim2 != 2:
        raise NotImplementedError("only DNorm defaults dim1=0, dim2=2 are supported")
    if attn.ndim != 4:
        raise NotImplementedError("expects a 4-D tensor (D0, D1, D2, D3)")

    d0, d1, d2, d3 = attn.shape
    itemsize = jnp.dtype(attn.dtype).itemsize
    vmem_cap = _vmem_capacity_bytes()

    # Generation-aware default block budget (f32-equivalent bytes):
    # larger tiles on 128 MiB-VMEM parts (v5e/v6e), smaller on v7x (64 MiB).
    if block_budget_bytes is None:
        block_budget_bytes = (12 << 20) if vmem_cap >= (96 << 20) else (2 << 20)

    # Keep the lane axis (last dim) a multiple of 128 so stores are unmasked.
    # Axis 3 is not a reduction axis, so zero-padding is simply sliced off.
    d3p = ((d3 + 127) // 128) * 128
    x_in = attn if d3p == d3 else jnp.pad(
        attn, ((0, 0), (0, 0), (0, 0), (0, d3p - d3)))

    def f32_block_bytes(t1, t3):
        return d0 * t1 * d2 * t3 * 4

    lane_candidates = sorted(
        {c for c in (d3p, 4096, 2048, 1024, 512, 256, 128)
         if c <= d3p and d3p % c == 0},
        reverse=True)

    # Widest lane tile whose single-D1-row block fits the f32 budget, then
    # grow the D1 tile as far as the budget allows.
    t1, t3 = 1, lane_candidates[-1]
    fits = False
    for cand_t3 in lane_candidates:
        per_row = f32_block_bytes(1, cand_t3)
        if per_row <= block_budget_bytes:
            t1 = _largest_divisor_leq(d1, block_budget_bytes // per_row)
            t3 = cand_t3
            fits = True
            break

    # v7x has two TensorCores: ensure >= 2 parallel blocks when possible.
    if (d1 // t1) * (d3p // t3) < 2:
        if d1 > 1:
            t1 = _largest_divisor_leq(d1, max(1, d1 // 2))
        else:
            smaller = [c for c in lane_candidates if c < t3]
            if smaller:
                t3 = smaller[0]

    # VMEM requirement: double-buffered in/out tiles (input dtype) plus the
    # in-kernel f32 temporaries, plus headroom for compiler scratch.
    io_tile = d0 * t1 * d2 * t3 * itemsize
    needed = 2 * (io_tile + io_tile) + 3 * f32_block_bytes(t1, t3) + (2 << 20)
    cap = int(0.85 * vmem_cap)
    if needed > cap:
        # TODO(synk): two-pass fallback (tile D2 and renormalize in a second
        # pass, or online softmax over D0) for shapes whose minimal
        # (d0, 1, d2, 128) block does not fit in VMEM.
        raise NotImplementedError(
            f"DNorm block needs ~{needed >> 20} MiB VMEM (> {cap >> 20} MiB usable)")
    vmem_limit = int(min(max(needed, 32 << 20), cap))

    block = (d0, t1, d2, t3)
    grid = (d1 // t1, d3p // t3)
    spec = pl.BlockSpec(block, lambda i, j: (0, i, 0, j))

    n_elem = d0 * d1 * d2 * d3p
    cost = pl.CostEstimate(flops=6 * n_elem, transcendentals=n_elem,
                           bytes_accessed=2 * n_elem * itemsize)

    out = pl.pallas_call(
        _dnorm_kernel,
        out_shape=jax.ShapeDtypeStruct(x_in.shape, attn.dtype),
        grid_spec=pltpu.PrefetchScalarGridSpec(
            num_scalar_prefetch=0,
            grid=grid,
            in_specs=[spec],
            out_specs=spec,
        ),
        compiler_params=pltpu.CompilerParams(
            dimension_semantics=("parallel", "parallel"),
            vmem_limit_bytes=vmem_limit,
        ),
        cost_estimate=cost,
    )(x_in)

    if d3p != d3:
        out = out[..., :d3]
    return out


def _reference_dnorm(attn, dim1=0, dim2=2):
    """Pure-JAX reference matching the PyTorch module exactly."""
    y = jax.nn.softmax(attn.astype(jnp.float32), axis=dim1)
    out = y / jnp.sum(y, axis=dim2, keepdims=True)
    return out.astype(attn.dtype)


if __name__ == "__main__":
    # Small attention-like 4-D tensor: softmax over axis 0, renorm over axis 2.
    D0, D1, D2, D3 = 8, 4, 16, 256

    key = jax.random.PRNGKey(0)
    attn = jax.random.normal(key, (D0, D1, D2, D3), dtype=jnp.float32)

    ref = jax.block_until_ready(_reference_dnorm(attn))

    # Default (auto-budget) path.
    out = jax.block_until_ready(dnorm(attn))
    assert out.shape == attn.shape and out.dtype == attn.dtype
    assert jnp.allclose(out, ref, rtol=1e-5, atol=1e-6), float(jnp.max(jnp.abs(out - ref)))

    # Force a multi-step grid (small f32 block budget) to exercise tiling.
    out_tiled = jax.block_until_ready(dnorm(attn, block_budget_bytes=128 * 1024))
    assert jnp.allclose(out_tiled, ref, rtol=1e-5, atol=1e-6), float(
        jnp.max(jnp.abs(out_tiled - ref)))

    # Non-128-multiple D3 exercises the lane-padding path.
    attn2 = jax.random.normal(jax.random.PRNGKey(1), (4, 2, 8, 96), dtype=jnp.float32)
    ref2 = jax.block_until_ready(_reference_dnorm(attn2))
    out2 = jax.block_until_ready(dnorm(attn2))
    assert out2.shape == attn2.shape
    assert jnp.allclose(out2, ref2, rtol=1e-5, atol=1e-6), float(
        jnp.max(jnp.abs(out2 - ref2)))

    print("KERNEL_OK")
</pallas_src>

<mosaic_0001>
module attributes {stable_mosaic.version = 11 : i64} {
  func.func @_dnorm_kernel(%arg0: i32, %arg1: i32, %arg2: memref<8x2x16x256xf32, #tpu.memory_space<vmem>>, %arg3: memref<8x2x16x256xf32, #tpu.memory_space<vmem>>) attributes {dimension_semantics = [#tpu.dimension_semantics<parallel>, #tpu.dimension_semantics<parallel>], iteration_bounds = array<i64: 2, 1>, scalar_prefetch = 0 : i64, scratch_operands = 0 : i64, tpu.core_type = #tpu.core_type<tc>, window_params = [{transform_indices = @transform_0, window_bounds = array<i64: 8, 2, 16, 256>}, {transform_indices = @transform_1, window_bounds = array<i64: 8, 2, 16, 256>}]} {
    %c0 = arith.constant 0 : index
    %c0_0 = arith.constant 0 : index
    %c0_1 = arith.constant 0 : index
    %c0_2 = arith.constant 0 : index
    %0 = vector.load %arg2[%c0, %c0_0, %c0_1, %c0_2] : memref<8x2x16x256xf32, #tpu.memory_space<vmem>>, vector<8x2x16x256xf32>
    %cst = arith.constant dense<0xFF800000> : vector<2x16x256xf32>
    %1 = vector.multi_reduction <maximumf>, %0, %cst [0] : vector<8x2x16x256xf32> to vector<2x16x256xf32>
    %2 = vector.shape_cast %1 : vector<2x16x256xf32> to vector<1x2x16x256xf32>
    %3 = vector.broadcast %2 : vector<1x2x16x256xf32> to vector<8x2x16x256xf32>
    %4 = arith.subf %0, %3 : vector<8x2x16x256xf32>
    %5 = math.exp %4 : vector<8x2x16x256xf32>
    %cst_3 = arith.constant dense<0.000000e+00> : vector<2x16x256xf32>
    %6 = vector.multi_reduction <add>, %5, %cst_3 [0] : vector<8x2x16x256xf32> to vector<2x16x256xf32>
    %7 = vector.shape_cast %6 : vector<2x16x256xf32> to vector<1x2x16x256xf32>
    %8 = tpu.reciprocal %7 : vector<1x2x16x256xf32> -> vector<1x2x16x256xf32>
    %9 = vector.broadcast %8 : vector<1x2x16x256xf32> to vector<8x2x16x256xf32>
    %10 = arith.mulf %5, %9 : vector<8x2x16x256xf32>
    %cst_4 = arith.constant dense<0.000000e+00> : vector<8x2x256xf32>
    %11 = vector.multi_reduction <add>, %10, %cst_4 [2] : vector<8x2x16x256xf32> to vector<8x2x256xf32>
    %12 = vector.shape_cast %11 : vector<8x2x256xf32> to vector<8x2x1x256xf32>
    %13 = tpu.reciprocal %12 : vector<8x2x1x256xf32> -> vector<8x2x1x256xf32>
    %14 = vector.broadcast %13 : vector<8x2x1x256xf32> to vector<8x2x16x256xf32>
    %15 = arith.mulf %10, %14 : vector<8x2x16x256xf32>
    %c0_5 = arith.constant 0 : index
    %c0_6 = arith.constant 0 : index
    %c0_7 = arith.constant 0 : index
    %c0_8 = arith.constant 0 : index
    %16 = vector.load %arg3[%c0_5, %c0_6, %c0_7, %c0_8] : memref<8x2x16x256xf32, #tpu.memory_space<vmem>>, vector<8x2x16x256xf32>
    tpu.vector_store %arg3[%c0_5, %c0_6, %c0_7, %c0_8], %15 {strides = array<i32>} : memref<8x2x16x256xf32, #tpu.memory_space<vmem>>, vector<8x2x16x256xf32>,
    return
  }
  func.func @transform_0(%arg0: i32, %arg1: i32) -> (i32, i32, i32, i32) {
    %c0_i32 = arith.constant 0 : i32
    %c0_i32_0 = arith.constant 0 : i32
    %c0_i32_1 = arith.constant 0 : i32
    return %c0_i32, %arg0, %c0_i32_0, %arg1 : i32, i32, i32, i32
  }
  func.func @transform_1(%arg0: i32, %arg1: i32) -> (i32, i32, i32, i32) {
    %c0_i32 = arith.constant 0 : i32
    %c0_i32_0 = arith.constant 0 : i32
    %c0_i32_1 = arith.constant 0 : i32
    return %c0_i32, %arg0, %c0_i32_0, %arg1 : i32, i32, i32, i32
  }
}

</mosaic_0001>

<bundles_post_ra>
// kernel: tpu_custom_call.1
= control target key start
LH: loop header
LB: loop body
LE: loop exit
PB: predicated region body
PF: predicated region fallthrough
CT: control target
= control target key end

     0   :  { %6 = vsyncpa [#allocation3], 0  ;;  %s4028_s0 = inlined_call_operand.hbm [shape: f32[8,4,16,256], index: 0, kind: input, shape index: {}]   ;;  %s4029_s1 = inlined_call_operand.hbm [shape: f32[8,4,16,256], index: 1, kind: output, shape index: {}]  }
   0x1   :  { %8 = vsyncpa [#allocation3 + $0x1], 0 }
   0x2   :  { %9 = vsyncpa [#allocation4], 0 }
   0x3   :  { %11 = vsyncpa [#allocation4 + $0x1], 0  ;;  %s2051_s6 = smov 0   ;;  %s2053_s7 = smov 0  }
   0x4   :  { %s2055_s8 = smov 0   ;;  %s2057_s9 = smov 0  }
   0x5   :  { %s2059_s10 = smov 0   ;;  %s2061_s11 = smov 0  }
   0x6 LB: > { %s1658_s12 = sadd.s32 4294967295, %s2026_s11   ;;  %s1659_s13 = sadd.s32 4294967294, %s2026_s11   ;;  %s2026_s11 = sphi %s2061_s11, %s17_s11   ;;  %s2022_s10 = sphi %s2059_s10, %s4290_s10   ;;  %s2018_s9 = sphi %s2057_s9, %s4289_s9   ;;  %s2014_s8 = sphi %s2055_s8, %s4288_s8   ;;  %s2010_s7 = sphi %s2053_s7, %s4287_s7   ;;  %s2006_s6 = sphi %s2051_s6, %s4286_s6  }
   0x7   : > { %s29_s14 = sadd.s32 1, %s2022_s10  ;;  %s38_s15 = sadd.s32 1, %s2014_s8 }
   0x8   : > { %p31_p0 = scmp.ge.s32.totalorder %s29_s14, 2  ;;  %p45_p1 = scmp.ne.s32.totalorder %s2014_s8, %s2010_s7 }
   0x9   : > { %p46_p2 = scmp.eq.s32.totalorder %s2026_s11, 0  ;;  %p51_p3 = scmp.ne.s32.totalorder %s2010_s7, %s2006_s6 }
   0xa   : > { %s4292_s14 = smov (%p31_p0, %s29_s14), 0  ;;  %p52_p5 = scmp.eq.s32.totalorder %s1658_s12, 0 }
   0xb   : > { %p2092_p4 = por %p46_p2, %p45_p1  ;;  %s33_s17 = ssub.s32 %s2022_s10, %s4292_s14 }
   0xc   : > { %p77_p6 = scmp.eq.s32.totalorder %s1658_s12, 1  ;;  %p36_p7 = scmp.eq.s32.totalorder %s33_s17, 0 }
   0xd   : > { %p2098_p8 = por %p52_p5, %p51_p3  ;;  %p83_p10 = scmp.eq.s32.totalorder %s1659_s13, 1 }
   0xe   : > { %p2102_p9 = por %p77_p6, %p45_p1  ;;  %p1661_p12 = scmp.ge.s32.totalorder %s2026_s11, 2 }
   0xf   : > { %s2107_s20 = scalar_select %p36_p7, %s2014_s8, %s38_s15  }
  0x10   : > { %p2109_p11 = por %p83_p10, %p51_p3  ;;  %99 = sbr.rel (%p1661_p12) target bundleno = 35 (0x23), region = 16 }
  0x15   : > { %s103_s22 = sand.u32 1, %s2014_s8   ;;  %s1678_s23 = sshll.u32 %s2022_s10, 6 }
  0x16   : > { %s1662_s24 = sshll.u32 %s103_s22, 9  ;;  %s115_s27 = scalar_lea.hbm %s4028_s0, %s1678_s23 }
  0x17   : > { %s1681_s28 = scalar_select %p2092_p4, [#allocation0], [#allocation10] }
  0x18   : > { %s128_s29 = sshll.u32 %s115_s27, 4  ;;  %s107_s30 = scalar_lea.vmem [#allocation2], %s1662_s24  ;;  %s129_s29 = int_to_ptr.hbm [resolvable:$true] %s128_s29 }
  0x19   : > { %s130_s2 = sshll.u32 %s107_s30, 4  ;;  %s120_s3 = sld [smem:[%s1681_s28]]   ;;  %s131_s2 = int_to_ptr.vmem [resolvable:$true] %s130_s2 }
  0x1a   : > { %s2028_s4 = smov 2048   ;;  %s2029_s5 = smov 1024  }
  0x1b   : > { %1682 = sst [smem:[#allocation7]] (%p2092_p4), %s2028_s4  ;;  %s2030_s12 = smov 4  }
  0x1c   : > { %1683 = sst [smem:[#allocation7 + $0x1]] (%p2092_p4), %s2029_s5  ;;  %s2031_s13 = smov 256  }
  0x1d   : > { %1684 = sst [smem:[#allocation7 + $0x2]] (%p2092_p4), %s2030_s12  ;;  %s2032_s23 = smov 16  }
  0x1e   : > { %1685 = sst [smem:[#allocation7 + $0x3]] (%p2092_p4), %s2031_s13  ;;  %s104_s24 = scalar_lea.sflag [#allocation3], %s103_s22 }
  0x1f   : > { %s1666_s15 = sshll.u32 %s120_s3, 26  ;;  %1686 = sst [smem:[#allocation7 + $0x4]] (%p2092_p4), %s2031_s13 }
  0x20   : > { %s1667_s17 = sadd.s32 134217728, %s1666_s15  ;;  %1687 = sst [smem:[#allocation7 + $0x5]] (%p2092_p4), %s2032_s23 }
  0x21   : > { %s2033_s25 = smov [#allocation6]  }
  0x22   : > { %1688 = dma.general (%p2092_p4), %s129_s29, 8192, %s131_s2, %s104_s24, %s2033_s25, [#allocation7], %s1667_s17, 0  }
  0x23 PF: > { %p1668_p13 = scmp.ge.s32.totalorder %s2026_s11, 1  ;;  %p151_p0 = scmp.lt.s32.totalorder %s2026_s11, 3 }
  0x25   : > { %p152_p1 = pnand %p1668_p13, %p151_p0 }
  0x27   : > { %155 = sbr.rel (%p152_p1) target bundleno = 375 (0x177), region = 24 }
  0x2c   : > { %s2140_s26 = sand.u32 1, %s2010_s7  }
  0x2d   : > { %s1669_s27 = sshll.u32 %s2140_s26, 9  ;;  %s158_s28 = scalar_lea.sflag [#allocation3], %s2140_s26 }
  0x2e   : > { %s2146_s22 = scalar_lea.vmem [#allocation2], %s1669_s27 }
  0x2f   : > { %1997 = dma.done.wait (%p2098_p8), %s158_s28, 8192  }
  0x30   : > { %1999 = vsyncadd (%p2098_p8), %s158_s28, 4294959104  ;;  %v2153_v0 = vld [vmem:[%s2146_s22] sm:$0xff]  ;;  %v2156_v1 = vld [vmem:[%s2146_s22 + $0x10] sm:$0xff]  ;;  %s2866_s16 = scalar_lea.vmem [#allocation5], %s1669_s27  ;;  %s1530_s18 = scalar_lea.sflag [#allocation4], %s2140_s26 }
  0x31   : > { %v2159_v2 = vld [vmem:[%s2146_s22 + $0x40] sm:$0xff]  ;;  %v2162_v3 = vld [vmem:[%s2146_s22 + $0x50] sm:$0xff]  ;;  %v2193_v16 = vld [vmem:[%s2146_s22 + $0x8] sm:$0xff] }
  0x32   : > { %v2165_v4 = vld [vmem:[%s2146_s22 + $0x80] sm:$0xff]  ;;  %v2168_v5 = vld [vmem:[%s2146_s22 + $0x90] sm:$0xff]  ;;  %v249_v6 = vmax.f32 %v2153_v0, %v2159_v2  ;;  %v263_v8 = vmax.f32 %v2156_v1, %v2162_v3  ;;  %v2196_v17 = vld [vmem:[%s2146_s22 + $0x18] sm:$0xff] }
  0x33   : > { %v2173_v7 = vld [vmem:[%s2146_s22 + $0xc0] sm:$0xff]  ;;  %v2178_v9 = vld [vmem:[%s2146_s22 + $0xd0] sm:$0xff]  ;;  %v2200_v19 = vld [vmem:[%s2146_s22 + $0x48] sm:$0xff] }
  0x34   : > { %v250_v10 = vmax.f32 %v249_v6, %v2165_v4  ;;  %v2182_v11 = vld [vmem:[%s2146_s22 + $0x100] sm:$0xff]  ;;  %v2185_v12 = vld [vmem:[%s2146_s22 + $0x110] sm:$0xff]  ;;  %v264_v13 = vmax.f32 %v263_v8, %v2168_v5  ;;  %v2203_v20 = vld [vmem:[%s2146_s22 + $0x58] sm:$0xff]  ;;  %v256_v25 = vmax.f32 %v2193_v16, %v2200_v19 }
  0x35   : > { %v2189_v14 = vld [vmem:[%s2146_s22 + $0x140] sm:$0xff]  ;;  %v2206_v21 = vld [vmem:[%s2146_s22 + $0x88] sm:$0xff]  ;;  %v2209_v22 = vld [vmem:[%s2146_s22 + $0x150] sm:$0xff]  ;;  %v270_v26 = vmax.f32 %v2196_v17, %v2203_v20 }
  0x36   : > { %v251_v15 = vmax.f32 %v250_v10, %v2173_v7  ;;  %v265_v18 = vmax.f32 %v264_v13, %v2178_v9  ;;  %v2213_v24 = vld [vmem:[%s2146_s22 + $0x98] sm:$0xff]  ;;  %v2220_v27 = vld [vmem:[%s2146_s22 + $0x180] sm:$0xff]  ;;  %v2224_v29 = vld [vmem:[%s2146_s22 + $0x190] sm:$0xff]  ;;  %v257_v33 = vmax.f32 %v256_v25, %v2206_v21 }
  0x37   : > { %v2228_v31 = vld [vmem:[%s2146_s22 + $0xc8] sm:$0xff]  ;;  %v2231_v32 = vld [vmem:[%s2146_s22 + $0xd8] sm:$0xff]  ;;  %v271_v34 = vmax.f32 %v270_v26, %v2213_v24  ;;  %v2236_v35 = vld [vmem:[%s2146_s22 + $0x1c0] sm:$0xff] }
  0x38   : > { %v252_v23 = vmax.f32 %v251_v15, %v2182_v11  ;;  %v266_v28 = vmax.f32 %v265_v18, %v2185_v12  ;;  %v2239_v36 = vld [vmem:[%s2146_s22 + $0x1d0] sm:$0xff]  ;;  %v2243_v38 = vld [vmem:[%s2146_s22 + $0x20] sm:$0xff]  ;;  %v258_v44 = vmax.f32 %v257_v33, %v2228_v31  ;;  %v2262_v47 = vld [vmem:[%s2146_s22 + $0x108] sm:$0xff] }
  0x39   : > { %v2247_v40 = vld [vmem:[%s2146_s22 + $0x30] sm:$0xff]  ;;  %v2250_v41 = vld [vmem:[%s2146_s22 + $0x60] sm:$0xff]  ;;  %v272_v45 = vmax.f32 %v271_v34, %v2231_v32  ;;  %v2265_v48 = vld [vmem:[%s2146_s22 + $0x118] sm:$0xff] }
  0x3a   : > { %v253_v30 = vmax.f32 %v252_v23, %v2189_v14  ;;  %v267_v37 = vmax.f32 %v266_v28, %v2209_v22  ;;  %v2253_v42 = vld [vmem:[%s2146_s22 + $0x70] sm:$0xff]  ;;  %v277_v49 = vmax.f32 %v2243_v38, %v2250_v41  ;;  %v2275_v52 = vld [vmem:[%s2146_s22 + $0xa0] sm:$0xff]  ;;  %v259_v58 = vmax.f32 %v258_v44, %v2262_v47  ;;  %v2293_v61 = vld [vmem:[%s2146_s22 + $0x148] sm:$0xff] }
  0x3b   : > { %v291_v50 = vmax.f32 %v2247_v40, %v2253_v42  ;;  %v2278_v53 = vld [vmem:[%s2146_s22 + $0xb0] sm:$0xff]  ;;  %v273_v59 = vmax.f32 %v272_v45, %v2265_v48  ;;  %v2296_v62 = vld [vmem:[%s2146_s22 + $0x158] sm:$0xff]  ;;  %v2319_v23 = vld [vmem:[%s2146_s22 + $0x188] sm:$0xff] }
  0x3c   : > { %v254_v39 = vmax.f32 %v253_v30, %v2220_v27  ;;  %v268_v43 = vmax.f32 %v267_v37, %v2224_v29  ;;  %v278_v63 = vmax.f32 %v277_v49, %v2275_v52  ;;  %v2322_v25 = vld [vmem:[%s2146_s22 + $0x198] sm:$0xff]  ;;  %v2329_v28 = vld [vmem:[%s2146_s22 + $0xe0] sm:$0xff]  ;;  %v2337_v37 = vld [vmem:[%s2146_s22 + $0x1c8] sm:$0xff] }
  0x3d   : > { %v274_v18 = vmax.f32 %v273_v59, %v2296_v62  ;;  %v2345_v44 = vld [vmem:[%s2146_s22 + $0x28] sm:$0xff] }
  0x3e   : > { %v2259_v46 = vmax.f32 %v254_v39, %v2236_v35  ;;  %v2272_v51 = vmax.f32 %v268_v43, %v2239_v36  ;;  %v2348_v45 = vld [vmem:[%s2146_s22 + $0x68] sm:$0xff] }
  0x3f   : > { %v275_v43 = vmax.f32 %v274_v18, %v2322_v25  ;;  %v284_v49 = vmax.f32 %v2345_v44, %v2348_v45 }
  0x40   : > { %v305_v54 = vsub.f32 %v2153_v0, %v2259_v46  ;;  %v313_v55 = vsub.f32 %v2159_v2, %v2259_v46  ;;  %v307_v56 = vsub.f32 %v2156_v1, %v2272_v51  ;;  %v315_v57 = vsub.f32 %v2162_v3, %v2272_v51 }
  0x41   : > { %v321_v60 = vsub.f32 %v2165_v4, %v2259_v46  ;;  %v292_v0 = vmax.f32 %v291_v50, %v2278_v53  ;;  %v323_v1 = vsub.f32 %v2168_v5, %v2272_v51  ;;  %v329_v2 = vsub.f32 %v2173_v7, %v2259_v46 }
  0x42   : > { %v331_v3 = vsub.f32 %v2178_v9, %v2272_v51  ;;  %v337_v4 = vsub.f32 %v2182_v11, %v2259_v46  ;;  %v339_v6 = vsub.f32 %v2185_v12, %v2272_v51  ;;  %v369_v8 = vmul.f32 1.442695, %v305_v54 }
  0x43   : > { %v373_v10 = vmul.f32 1.442695, %v307_v56  ;;  %v385_v13 = vmul.f32 1.442695, %v313_v55  ;;  %v345_v5 = vsub.f32 %v2189_v14, %v2259_v46  ;;  %v389_v15 = vmul.f32 1.442695, %v315_v57 }
  0x44   : > { %v260_v7 = vmax.f32 %v259_v58, %v2293_v61  ;;  %v347_v9 = vsub.f32 %v2209_v22, %v2272_v51  ;;  %v353_v11 = vsub.f32 %v2220_v27, %v2259_v46  ;;  %1764 = vpow2.f32 %v369_v8  ;;  %v2332_v27 = vld [vmem:[%s2146_s22 + $0xf0] sm:$0xff]  ;;  %v2361_v55 = vld [vmem:[%s2146_s22 + $0x120] sm:$0xff]  ;;  %v2367_v57 = vld [vmem:[%s2146_s22 + $0xa8] sm:$0xff] }
  0x45   : > { %v401_v12 = vmul.f32 1.442695, %v321_v60  ;;  %v355_v14 = vsub.f32 %v2224_v29, %v2272_v51  ;;  %v361_v26 = vsub.f32 %v2236_v35, %v2259_v46  ;;  %1766 = vpow2.f32 %v373_v10  ;;  %v2340_v29 = vld [vmem:[%s2146_s22 + $0x1d8] sm:$0xff]  ;;  %v2364_v56 = vld [vmem:[%s2146_s22 + $0x130] sm:$0xff] }
  0x46   : > { %v405_v22 = vmul.f32 1.442695, %v323_v1  ;;  %v363_v30 = vsub.f32 %v2239_v36, %v2272_v51  ;;  %1768 = vpow2.f32 %v385_v13  ;;  %v417_v33 = vmul.f32 1.442695, %v329_v2 }
  0x47   : > { %v421_v34 = vmul.f32 1.442695, %v331_v3  ;;  %1770 = vpow2.f32 %v389_v15  ;;  %v433_v35 = vmul.f32 1.442695, %v337_v4  ;;  %v261_v39 = vmax.f32 %v260_v7, %v2319_v23 }
  0x48   : > { %1772 = vpow2.f32 %v401_v12  ;;  %v279_v36 = vmax.f32 %v278_v63, %v2329_v28  ;;  %v293_v46 = vmax.f32 %v292_v0, %v2332_v27  ;;  %v437_v50 = vmul.f32 1.442695, %v339_v6 }
  0x49   : > { %1774 = vpow2.f32 %v405_v22  ;;  %v2355_v51 = vmax.f32 %v261_v39, %v2337_v37  ;;  %v2358_v54 = vmax.f32 %v275_v43, %v2340_v29  ;;  %v449_v59 = vmul.f32 1.442695, %v345_v5 }
  0x4a   : > { %v2369_v58 = vpop.eup %1764  ;;  %1776 = vpow2.f32 %v417_v33  ;;  %v453_v60 = vmul.f32 1.442695, %v347_v9  ;;  %v465_v63 = vmul.f32 1.442695, %v353_v11  ;;  %v469_v1 = vmul.f32 1.442695, %v355_v14 }
  0x4b   : > { %v2371_v0 = vpop.eup %1766  ;;  %1778 = vpow2.f32 %v421_v34  ;;  %v481_v2 = vmul.f32 1.442695, %v361_v26  ;;  %v485_v3 = vmul.f32 1.442695, %v363_v30  ;;  %v2376_v6 = vmax.f32 %v279_v36, %v2361_v55 }
  0x4c   : > { %v2373_v4 = vpop.eup %1768  ;;  %1780 = vpow2.f32 %v433_v35  ;;  %v2379_v8 = vmax.f32 %v293_v46, %v2364_v56  ;;  %v2382_v10 = vmax.f32 %v284_v49, %v2367_v57  ;;  %v306_v15 = vsub.f32 %v2193_v16, %v2355_v51 }
  0x4d   : > { %v2384_v13 = vpop.eup %1770  ;;  %1782 = vpow2.f32 %v437_v50  ;;  %v497_v5 = vadd.f32 %v2373_v4, %v2369_v58  ;;  %v308_v7 = vsub.f32 %v2196_v17, %v2358_v54  ;;  %v314_v11 = vsub.f32 %v2200_v19, %v2355_v51 }
  0x4e   : > { %v2392_v18 = vpop.eup %1772  ;;  %1784 = vpow2.f32 %v449_v59  ;;  %v511_v9 = vadd.f32 %v2384_v13, %v2371_v0  ;;  %v316_v12 = vsub.f32 %v2203_v20, %v2358_v54  ;;  %v322_v17 = vsub.f32 %v2206_v21, %v2355_v51 }
  0x4f   : > { %v2400_v14 = vpop.eup %1774  ;;  %1786 = vpow2.f32 %v453_v60  ;;  %v498_v16 = vadd.f32 %v2392_v18, %v497_v5  ;;  %v324_v26 = vsub.f32 %v2213_v24, %v2358_v54  ;;  %v330_v19 = vsub.f32 %v2228_v31, %v2355_v51 }
  0x50   : > { %v2407_v22 = vpop.eup %1776  ;;  %1788 = vpow2.f32 %v465_v63  ;;  %v512_v30 = vadd.f32 %v2400_v14, %v511_v9  ;;  %v332_v20 = vsub.f32 %v2231_v32, %v2358_v54  ;;  %v338_v21 = vsub.f32 %v2262_v47, %v2355_v51 }
  0x51   : > { %v2414_v33 = vpop.eup %1778  ;;  %1790 = vpow2.f32 %v469_v1  ;;  %v499_v34 = vadd.f32 %v2407_v22, %v498_v16  ;;  %v340_v24 = vsub.f32 %v2265_v48, %v2358_v54  ;;  %v371_v31 = vmul.f32 1.442695, %v306_v15 }
  0x52   : > { %4069 = vst [vmem:[#allocation13_spill] sm:$0xff] %v2414_v33  ;;  %v2421_v35 = vpop.eup %1780  ;;  %1792 = vpow2.f32 %v481_v2  ;;  %v513_v39 = vadd.f32 %v2414_v33, %v512_v30  ;;  %v375_v43 = vmul.f32 1.442695, %v308_v7  ;;  %v387_v46 = vmul.f32 1.442695, %v314_v11  ;;  %v2458_v30 = vld [vmem:[%s2146_s22 + $0x170] sm:$0xff] }
  0x53   : > { %4070 = vst [vmem:[#allocation14_spill] sm:$0xff] %v2421_v35  ;;  %v2424_v36 = vpop.eup %1782  ;;  %1794 = vpow2.f32 %v485_v3  ;;  %v500_v32 = vadd.f32 %v2421_v35, %v499_v34  ;;  %v391_v49 = vmul.f32 1.442695, %v316_v12  ;;  %v346_v48 = vsub.f32 %v2293_v61, %v2355_v51 }
  0x54   : > { %4071 = vst [vmem:[#allocation15_spill] sm:$0xff] %v2424_v36  ;;  %v2427_v50 = vpop.eup %1784  ;;  %v514_v47 = vadd.f32 %v2424_v36, %v513_v39  ;;  %1796 = vpow2.f32 %v371_v31  ;;  %v403_v59 = vmul.f32 1.442695, %v322_v17  ;;  %v348_v1 = vsub.f32 %v2296_v62, %v2358_v54 }
  0x55   : > { %4072 = vst [vmem:[#allocation16_spill] sm:$0xff] %v2427_v50  ;;  %v2432_v60 = vpop.eup %1786  ;;  %v501_v63 = vadd.f32 %v2427_v50, %v500_v32  ;;  %1798 = vpow2.f32 %v375_v43  ;;  %v407_v2 = vmul.f32 1.442695, %v324_v26  ;;  %v354_v61 = vsub.f32 %v2319_v23, %v2355_v51  ;;  %v2455_v26 = vld [vmem:[%s2146_s22 + $0x160] sm:$0xff]  ;;  %v2477_v32 = vld [vmem:[%s2146_s22 + $0x1b0] sm:$0xff]  ;;  %v2548_v50 = vld [vmem:[%s2146_s22 + $0x128] sm:$0xff] }
  0x56   : > { %4073 = vst [vmem:[#allocation17_spill] sm:$0xff] %v2432_v60  ;;  %v2437_v3 = vpop.eup %1788  ;;  %v515_v5 = vadd.f32 %v2432_v60, %v514_v47  ;;  %1800 = vpow2.f32 %v387_v46  ;;  %v419_v15 = vmul.f32 1.442695, %v330_v19  ;;  %v356_v62 = vsub.f32 %v2322_v25, %v2358_v54  ;;  %v2474_v43 = vld [vmem:[%s2146_s22 + $0x1a0] sm:$0xff] }
  0x57   : > { %4074 = vst [vmem:[#allocation18_spill] sm:$0xff] %v2437_v3  ;;  %v2442_v7 = vpop.eup %1790  ;;  %v502_v9 = vadd.f32 %v2437_v3, %v501_v63  ;;  %v362_v11 = vsub.f32 %v2337_v37, %v2355_v51  ;;  %1802 = vpow2.f32 %v391_v49  ;;  %v364_v23 = vsub.f32 %v2340_v29, %v2358_v54 }
  0x58   : > { %4075 = vst [vmem:[#allocation19_spill] sm:$0xff] %v2442_v7  ;;  %v2449_v12 = vpop.eup %1792  ;;  %v516_v16 = vadd.f32 %v2442_v7, %v515_v5  ;;  %1804 = vpow2.f32 %v403_v59  ;;  %v423_v17 = vmul.f32 1.442695, %v332_v20  ;;  %v435_v51 = vmul.f32 1.442695, %v338_v21 }
  0x59   : > { %4076 = vst [vmem:[#allocation20_spill] sm:$0xff] %v2449_v12  ;;  %v2460_v25 = vpop.eup %1794  ;;  %v2463_v37 = vadd.f32 %v2449_v12, %v502_v9  ;;  %1806 = vpow2.f32 %v407_v2  ;;  %v439_v19 = vmul.f32 1.442695, %v340_v24  ;;  %v451_v54 = vmul.f32 1.442695, %v346_v48 }
  0x5a   : > { %4077 = vst [vmem:[#allocation21_spill] sm:$0xff] %v2460_v25  ;;  %v2465_v34 = vpop.eup %1796  ;;  %v2468_v29 = vadd.f32 %v2460_v25, %v516_v16  ;;  %1808 = vpow2.f32 %v419_v15  ;;  %v455_v20 = vmul.f32 1.442695, %v348_v1  ;;  %v467_v31 = vmul.f32 1.442695, %v354_v61 }
  0x5b   : > { %v2470_v39 = vpop.eup %1798  ;;  %1810 = vrcp.f32 %v2463_v37  ;;  %v281_v21 = vmax.f32 %v2376_v6, %v2455_v26  ;;  %v295_v24 = vmax.f32 %v2379_v8, %v2458_v30  ;;  %v471_v49 = vmul.f32 1.442695, %v356_v62 }
  0x5c   : > { %v2483_v46 = vpop.eup %1800  ;;  %1812 = vrcp.f32 %v2468_v29  ;;  %v483_v47 = vmul.f32 1.442695, %v362_v11  ;;  %v487_v48 = vmul.f32 1.442695, %v364_v23  ;;  %v562_v63 = vand.u32 2147483647, %v2463_v37 }
  0x5d   : > { %v2486_v59 = vpop.eup %1802  ;;  %v564_v1 = vand.u32 2147483648, %v2463_v37  ;;  %1814 = vpow2.f32 %v423_v17  ;;  %v504_v6 = vadd.f32 %v2483_v46, %v2465_v34  ;;  %vm558_vm0 = vweird.f32 %v2463_v37  ;;  %v2504_v11 = vld [vmem:[%s2146_s22 + $0xe8] sm:$0xff] }
  0x5e   : > { %v2492_v2 = vpop.eup %1804  ;;  %v590_v8 = vand.u32 2147483647, %v2468_v29  ;;  %1816 = vpow2.f32 %v435_v51  ;;  %v518_v5 = vadd.f32 %v2486_v59, %v2470_v39  ;;  %v282_v9 = vmax.f32 %v281_v21, %v2474_v43  ;;  %v2512_v51 = vld [vmem:[%s2146_s22 + $0x1e0] sm:$0xff] }
  0x5f   : > { %v2498_v61 = vpop.eup %1806  ;;  %1818 = vpow2.f32 %v439_v19  ;;  %v505_v15 = vadd.f32 %v2492_v2, %v504_v6  ;;  %v296_v62 = vmax.f32 %v295_v24, %v2477_v32  ;;  %vm586_vm1 = vweird.f32 %v2468_v29  ;;  %v2515_v19 = vld [vmem:[%s2146_s22 + $0x1f0] sm:$0xff] }
  0x60   : > { %v2506_v16 = vpop.eup %1808  ;;  %v592_v23 = vand.u32 2147483648, %v2468_v29  ;;  %1820 = vpow2.f32 %v451_v54  ;;  %v519_v17 = vadd.f32 %v2498_v61, %v518_v5  ;;  %vm2517_vm2 = vcmp.eq.f32.partialorder %v562_v63, 8.507059e+37 }
  0x61   : > { %4078 = vst [vmem:[#allocation22_spill] sm:$0xff] %v2506_v16  ;;  %v1811_v6 = vpop.eup %1810  ;;  %v565_v24 = vor.u32 1.1754944e-38, %v564_v1  ;;  %1822 = vpow2.f32 %v455_v20  ;;  %v506_v25 = vadd.f32 %v2506_v16, %v505_v15  ;;  %vm2523_vm3 = vcmp.eq.f32.partialorder %v590_v8, 8.507059e+37  ;;  %v2539_v15 = vld [vmem:[%s2146_s22 + $0x38] sm:$0xff] }
  0x62   : > { %v1813_v12 = vpop.eup %1812  ;;  %v554_v54 = vmul.f32 %v1811_v6, %v2463_v37  ;;  %1824 = vpow2.f32 %v467_v31  ;;  %v286_v7 = vmax.f32 %v2382_v10, %v2504_v11  ;;  %v2533_v20 = vmax.f32 %v282_v9, %v2512_v51  ;;  %v2542_v8 = vld [vmem:[%s2146_s22 + $0x78] sm:$0xff] }
  0x63   : > { %v2529_v63 = vpop.eup %1814  ;;  %v582_v3 = vmul.f32 %v1813_v12, %v2468_v29  ;;  %1826 = vpow2.f32 %v471_v49  ;;  %v2536_v1 = vmax.f32 %v296_v62, %v2515_v19  ;;  %vm559_vm4 = vweird.f32 %v1811_v6 }
  0x64   : > { %v2544_v60 = vpop.eup %1816  ;;  %v555_v31 = vsub.f32 1.0, %v554_v54  ;;  %1828 = vpow2.f32 %v483_v47  ;;  %v520_v10 = vadd.f32 %v2529_v63, %v519_v17  ;;  %vm587_vm5 = vweird.f32 %v1813_v12  ;;  %vm2563_vm6 = vmor %vm558_vm0, %vm559_vm4 }
  0x65   : > { %4083 = vst [vmem:[#allocation23_spill] sm:$0xff] %v2544_v60  ;;  %v2550_v49 = vpop.eup %1818  ;;  %v583_v9 = vsub.f32 1.0, %v582_v3  ;;  %1830 = vpow2.f32 %v487_v48  ;;  %v507_v62 = vadd.f32 %v2544_v60, %v506_v25  ;;  %v593_v16 = vor.u32 1.1754944e-38, %v592_v23  ;;  %vm2578_vm7 = vmor %vm586_vm1, %vm587_vm5 }
  0x66   : > { %4084 = vst [vmem:[#allocation24_spill] sm:$0xff] %v2550_v49  ;;  %v2553_v36 = vpop.eup %1820  ;;  %v556_v35 = vmul.f32 %v1811_v6, %v555_v31  ;;  %v521_v33 = vadd.f32 %v2550_v49, %v520_v10  ;;  %v309_v23 = vsub.f32 %v2243_v38, %v2533_v20  ;;  %v2571_v17 = vmax.f32 %v286_v7, %v2548_v50 }
  0x67   : > { %4085 = vst [vmem:[#allocation25_spill] sm:$0xff] %v2553_v36  ;;  %v2558_v54 = vpop.eup %1822  ;;  %v584_v48 = vmul.f32 %v1813_v12, %v583_v9  ;;  %v508_v25 = vadd.f32 %v2553_v36, %v507_v62  ;;  %v311_v62 = vsub.f32 %v2247_v40, %v2536_v1  ;;  %v317_v38 = vsub.f32 %v2250_v41, %v2533_v20 }
  0x68   : > { %4086 = vst [vmem:[#allocation26_spill] sm:$0xff] %v2558_v54  ;;  %v2573_v31 = vpop.eup %1824  ;;  %v557_v10 = vadd.f32 %v1811_v6, %v556_v35  ;;  %v522_v9 = vadd.f32 %v2558_v54, %v521_v33  ;;  %v319_v29 = vsub.f32 %v2253_v42, %v2536_v1  ;;  %v325_v36 = vsub.f32 %v2275_v52, %v2533_v20 }
  0x69   : > { %4089 = vst [vmem:[#allocation27_spill] sm:$0xff] %v2573_v31  ;;  %v2587_v7 = vpop.eup %1826  ;;  %v585_v47 = vadd.f32 %v1813_v12, %v584_v48  ;;  %v509_v35 = vadd.f32 %v2573_v31, %v508_v25  ;;  %v327_v41 = vsub.f32 %v2278_v53, %v2536_v1  ;;  %v333_v48 = vsub.f32 %v2329_v28, %v2533_v20 }
  0x6a   : > { %4092 = vst [vmem:[#allocation28_spill] sm:$0xff] %v2587_v7  ;;  %v2594_v49 = vpop.eup %1828  ;;  %v561_v33 = vsel %vm2563_vm6, %v1811_v6, %v557_v10  ;;  %v523_v40 = vadd.f32 %v2587_v7, %v522_v9  ;;  %v335_v6 = vsub.f32 %v2332_v27, %v2536_v1  ;;  %v343_v27 = vsub.f32 %v2364_v56, %v2536_v1  ;;  %v2664_v7 = vld [vmem:[%s2146_s22 + $0x168] sm:$0xff] }
  0x6b   : > { %4093 = vst [vmem:[#allocation29_spill] sm:$0xff] %v2594_v49  ;;  %v2603_v25 = vpop.eup %1830  ;;  %v2607_v42 = vsel %vm2517_vm2, %v565_v24, %v561_v33  ;;  %v589_v52 = vsel %vm2578_vm7, %v1813_v12, %v585_v47  ;;  %v510_v3 = vadd.f32 %v2594_v49, %v509_v35  ;;  %v341_v24 = vsub.f32 %v2361_v55, %v2533_v20 }
  0x6c   : > { %4094 = vst [vmem:[#allocation30_spill] sm:$0xff] %v2603_v25  ;;  %v2616_v53 = vsel %vm2523_vm3, %v593_v16, %v589_v52  ;;  %v2620_v28 = vmul.f32 %v2369_v58, %v2607_v42  ;;  %v2623_v21 = vadd.f32 %v2603_v25, %v523_v40  ;;  %v349_v16 = vsub.f32 %v2455_v26, %v2533_v20 }
  0x6d   : > { %v2629_v12 = vmul.f32 %v2371_v0, %v2616_v53  ;;  %1832 = vrcp.f32 %v510_v3  ;;  %v351_v58 = vsub.f32 %v2458_v30, %v2536_v1  ;;  %v357_v5 = vsub.f32 %v2474_v43, %v2533_v20 }
  0x6e   : > { %1834 = vrcp.f32 %v2623_v21  ;;  %v576_v47 = vand.u32 2147483647, %v510_v3  ;;  %v578_v10 = vand.u32 2147483648, %v510_v3  ;;  %v604_v56 = vand.u32 2147483647, %v2623_v21 }
  0x6f   : > { %v729_v0 = vadd.f32 %v2629_v12, %v2620_v28  ;;  %v606_v26 = vand.u32 2147483648, %v2623_v21  ;;  %v377_v9 = vmul.f32 1.442695, %v309_v23  ;;  %v381_v30 = vmul.f32 1.442695, %v311_v62 }
  0x70   : > { %vm572_vm8 = vweird.f32 %v510_v3  ;;  %v393_v43 = vmul.f32 1.442695, %v317_v38  ;;  %v397_v33 = vmul.f32 1.442695, %v319_v29  ;;  %vm600_vm9 = vweird.f32 %v2623_v21 }
  0x71   : > { %v730_v35 = vrot.slane %v729_v0, 4  ;;  %1836 = vpow2.f32 %v377_v9  ;;  %v409_v52 = vmul.f32 1.442695, %v325_v36  ;;  %vm2651_vm10 = vcmp.eq.f32.partialorder %v576_v47, 8.507059e+37 }
  0x72   : > { %v579_v37 = vor.u32 1.1754944e-38, %v578_v10  ;;  %1838 = vpow2.f32 %v381_v30  ;;  %v413_v23 = vmul.f32 1.442695, %v327_v41  ;;  %vm2657_vm11 = vcmp.eq.f32.partialorder %v604_v56, 8.507059e+37 }
  0x73   : > { %v1833_v55 = vpop.eup %1832  ;;  %v731_v25 = vadd.f32 %v730_v35, %v729_v0  ;;  %v607_v40 = vor.u32 1.1754944e-38, %v606_v26  ;;  %1840 = vpow2.f32 %v393_v43  ;;  %v425_v36 = vmul.f32 1.442695, %v333_v48 }
  0x74   : > { %v2655_v62 = vpop.eup %1834  ;;  %v568_v38 = vmul.f32 %v1833_v55, %v510_v3  ;;  %1842 = vpow2.f32 %v397_v33  ;;  %v429_v47 = vmul.f32 1.442695, %v335_v6  ;;  %vm573_vm12 = vweird.f32 %v1833_v55 }
  0x75   : > { %v732_v9 = vrot.slane %v731_v25, 2  ;;  %v596_v0 = vmul.f32 %v2655_v62, %v2623_v21  ;;  %1844 = vpow2.f32 %v409_v52  ;;  %v441_v41 = vmul.f32 1.442695, %v341_v24  ;;  %vm2673_vm14 = vmor %vm572_vm8, %vm573_vm12 }
  0x76   : > { %v569_v10 = vsub.f32 1.0, %v568_v38  ;;  %1846 = vpow2.f32 %v413_v23  ;;  %v445_v56 = vmul.f32 1.442695, %v343_v27  ;;  %vm601_vm13 = vweird.f32 %v2655_v62 }
  0x77   : > { %v733_v30 = vadd.f32 %v732_v9, %v731_v25  ;;  %v597_v35 = vsub.f32 1.0, %v596_v0  ;;  %v2666_v26 = vpop.eup %1836  ;;  %1848 = vpow2.f32 %v425_v36  ;;  %v457_v43 = vmul.f32 1.442695, %v349_v16  ;;  %v2681_v36 = vld [vmem:[%s2146_s22 + $0xb8] sm:$0xff]  ;;  %v2684_v16 = vld [vmem:[%s2146_s22 + $0x1a8] sm:$0xff]  ;;  %vm2697_vm15 = vmor %vm600_vm9, %vm601_vm13 }
  0x78   : > { %v570_v48 = vmul.f32 %v1833_v55, %v569_v10  ;;  %v2669_v6 = vpop.eup %1838  ;;  %1850 = vpow2.f32 %v429_v47  ;;  %v461_v27 = vmul.f32 1.442695, %v351_v58  ;;  %v473_v38 = vmul.f32 1.442695, %v357_v5 }
  0x79   : > { %v734_v33 = vrot.slane %v733_v30, 1  ;;  %v598_v24 = vmul.f32 %v2655_v62, %v597_v35  ;;  %v2678_v52 = vpop.eup %1840  ;;  %1852 = vpow2.f32 %v441_v41  ;;  %v288_v3 = vmax.f32 %v2571_v17, %v2664_v7 }
  0x7a   : > { %v571_v23 = vadd.f32 %v1833_v55, %v570_v48  ;;  %v2688_v9 = vpop.eup %1842  ;;  %1854 = vpow2.f32 %v445_v56  ;;  %v525_v5 = vadd.f32 %v2678_v52, %v2666_v26  ;;  %v4103_v41 = vsub.f32 %v2477_v32, %v2536_v1 }
  0x7b   : > { %v2690_v0 = vadd.f32 %v734_v33, %v733_v30  ;;  %v599_v10 = vadd.f32 %v2655_v62, %v598_v24  ;;  %v2703_v17 = vpop.eup %1844  ;;  %1856 = vpow2.f32 %v457_v43  ;;  %v539_v30 = vadd.f32 %v2688_v9, %v2669_v6 }
  0x7c   : > { %v575_v47 = vsel %vm2673_vm14, %v1833_v55, %v571_v23  ;;  %v477_v21 = vmul.f32 1.442695, %v4103_v41  ;;  %v2712_v35 = vpop.eup %1846  ;;  %v4104_v56 = vsub.f32 %v2512_v51, %v2533_v20  ;;  %v289_v33 = vmax.f32 %v288_v3, %v2684_v16  ;;  %v2734_v20 = vld [vmem:[%s2146_s22 + $0xf8] sm:$0xff]  ;;  %v2737_v23 = vld [vmem:[%s2146_s22 + $0x1e8] sm:$0xff] }
  0x7d   : > { %1858 = vrcp.f32 %v2690_v0  ;;  %v4105_v55 = vmax.f32 %v2539_v15, %v2542_v8  ;;  %v2723_v32 = vpop.eup %1848  ;;  %v2727_v25 = vsel %vm2651_vm10, %v579_v37, %v575_v47  ;;  %v603_v24 = vsel %vm2697_vm15, %v2655_v62, %v599_v10 }
  0x7e   : > { %v489_v48 = vmul.f32 1.442695, %v4104_v56  ;;  %1860 = vpow2.f32 %v461_v27  ;;  %v526_v51 = vadd.f32 %v2703_v17, %v525_v5  ;;  %v2739_v3 = vpop.eup %1850  ;;  %v962_v41 = vand.u32 2147483647, %v2690_v0  ;;  %v2762_v5 = vld [vmem:[%s2146_s22 + $0x138] sm:$0xff] }
  0x7f   : > { %v299_v43 = vmax.f32 %v4105_v55, %v2681_v36  ;;  %4106 = vst [vmem:[#allocation31_spill] sm:$0xff] %v2739_v3  ;;  %v2744_v49 = vsel %vm2657_vm11, %v607_v40, %v603_v24  ;;  %v2748_v37 = vmul.f32 %v2465_v34, %v2727_v25  ;;  %v4107_v62 = vsub.f32 %v2515_v19, %v2536_v1  ;;  %v2753_v10 = vpop.eup %1852  ;;  %v2778_v55 = vld [vmem:[%s2146_s22 + $0x178] sm:$0xff] }
  0x80   : > { %4108 = vst [vmem:[#allocation32_spill] sm:$0xff] %v2753_v10  ;;  %v2757_v58 = vmul.f32 %v2470_v39, %v2744_v49  ;;  %1862 = vpow2.f32 %v473_v38  ;;  %v527_v29 = vadd.f32 %v2723_v32, %v526_v51  ;;  %v540_v40 = vadd.f32 %v2712_v35, %v539_v30  ;;  %v2764_v34 = vpop.eup %1854 }
  0x81   : > { %v493_v27 = vmul.f32 1.442695, %v4107_v62  ;;  %4109 = vst [vmem:[#allocation33_spill] sm:$0xff] %v2764_v34  ;;  %v964_v47 = vand.u32 2147483648, %v2690_v0  ;;  %1864 = vpow2.f32 %v477_v21  ;;  %v2768_v19 = vmax.f32 %v289_v33, %v2737_v23  ;;  %v2771_v39 = vpop.eup %1856 }
  0x82   : > { %v300_v1 = vmax.f32 %v299_v43, %v2734_v20  ;;  %4110 = vst [vmem:[#allocation34_spill] sm:$0xff] %v2771_v39  ;;  %v736_v38 = vadd.f32 %v2757_v58, %v2748_v37  ;;  %1866 = vpow2.f32 %v489_v48  ;;  %v528_v30 = vadd.f32 %v2753_v10, %v527_v29  ;;  %v2791_v29 = vld [vmem:[%s2146_s22 + $0x1b8] sm:$0xff] }
  0x83   : > { %v541_v56 = vadd.f32 %v2739_v3, %v540_v40  ;;  %v1859_v24 = vpop.eup %1858  ;;  %vm958_vm0 = vweird.f32 %v2690_v0  ;;  %vm2781_vm1 = vcmp.eq.f32.partialorder %v962_v41, 8.507059e+37  ;;  %1868 = vpow2.f32 %v493_v27 }
  0x84   : > { %v301_v33 = vmax.f32 %v300_v1, %v2762_v5  ;;  %v2786_v43 = vpop.eup %1860  ;;  %v954_v48 = vmul.f32 %v1859_v24, %v2690_v0  ;;  %v737_v51 = vrot.slane %v736_v38, 4  ;;  %v529_v62 = vadd.f32 %v2771_v39, %v528_v30 }
  0x85   : > { %4113 = vst [vmem:[#allocation35_spill] sm:$0xff] %v2786_v43  ;;  %v310_v40 = vsub.f32 %v2345_v44, %v2768_v19  ;;  %v965_v41 = vor.u32 1.1754944e-38, %v964_v47  ;;  %v542_v31 = vadd.f32 %v2764_v34, %v541_v56  ;;  %v318_v1 = vsub.f32 %v2348_v45, %v2768_v19  ;;  %v2808_v56 = vld [vmem:[%s2146_s22 + $0x1f8] sm:$0xff] }
  0x86   : > { %v302_v27 = vmax.f32 %v301_v33, %v2778_v55  ;;  %v2799_v54 = vpop.eup %1862  ;;  %v955_v10 = vsub.f32 1.0, %v954_v48  ;;  %vm959_vm2 = vweird.f32 %v1859_v24  ;;  %v738_v60 = vadd.f32 %v737_v51, %v736_v38 }
  0x87   : > { %4114 = vst [vmem:[#allocation36_spill] sm:$0xff] %v2799_v54  ;;  %v326_v30 = vsub.f32 %v2367_v57, %v2768_v19  ;;  %v2803_v39 = vpop.eup %1864  ;;  %v530_v44 = vadd.f32 %v2799_v54, %v529_v62  ;;  %v543_v47 = vadd.f32 %v2786_v43, %v542_v31  ;;  %v379_v51 = vmul.f32 1.442695, %v310_v40  ;;  %vm2822_vm3 = vmor %vm958_vm0, %vm959_vm2 }
  0x88   : > { %4115 = vst [vmem:[#allocation37_spill] sm:$0xff] %v2803_v39  ;;  %v303_v33 = vmax.f32 %v302_v27, %v2791_v29  ;;  %v2813_v34 = vpop.eup %1866  ;;  %v956_v48 = vmul.f32 %v1859_v24, %v955_v10  ;;  %v739_v38 = vrot.slane %v738_v60, 2 }
  0x89   : > { %4116 = vst [vmem:[#allocation38_spill] sm:$0xff] %v2813_v34  ;;  %v2817_v3 = vpop.eup %1868  ;;  %v2827_v62 = vadd.f32 %v2813_v34, %v530_v44  ;;  %v544_v27 = vadd.f32 %v2803_v39, %v543_v47  ;;  %1870 = vpow2.f32 %v379_v51  ;;  %v395_v47 = vmul.f32 1.442695, %v318_v1 }
  0x8a   : > { %4117 = vst [vmem:[#allocation39_spill] sm:$0xff] %v2817_v3  ;;  %v957_v57 = vadd.f32 %v1859_v24, %v956_v48  ;;  %v740_v45 = vadd.f32 %v739_v38, %v738_v60  ;;  %v2835_v54 = vmax.f32 %v303_v33, %v2808_v56  ;;  %v411_v38 = vmul.f32 1.442695, %v326_v30 }
  0x8b   : > { %v2838_v0 = vadd.f32 %v2817_v3, %v544_v27  ;;  %1872 = vrcp.f32 %v2827_v62  ;;  %v618_v60 = vand.u32 2147483647, %v2827_v62  ;;  %v620_v33 = vand.u32 2147483648, %v2827_v62 }
  0x8c   : > { %v961_v10 = vsel %vm2822_vm3, %v1859_v24, %v957_v57  ;;  %v741_v34 = vrot.slane %v740_v45, 1  ;;  %vm614_vm4 = vweird.f32 %v2827_v62  ;;  %v312_v57 = vsub.f32 %v2539_v15, %v2835_v54 }
  0x8d   : > { %v966_v48 = vsel %vm2781_vm1, %v965_v41, %v961_v10  ;;  %1874 = vrcp.f32 %v2838_v0  ;;  %v2857_v31 = vor.u32 1.1754944e-38, %v620_v33  ;;  %vm642_vm5 = vweird.f32 %v2838_v0 }
  0x8e   : > { %v1401_v51 = vmul.f32 %v966_v48, %v2620_v28  ;;  %v2852_v1 = vadd.f32 %v741_v34, %v740_v45  ;;  %v1403_v24 = vmul.f32 %v966_v48, %v2629_v12  ;;  %v646_v21 = vand.u32 2147483647, %v2838_v0 }
  0x8f   : > { %v648_v41 = vand.u32 2147483648, %v2838_v0  ;;  %v2862_v27 = vpop.eup %1870  ;;  %vm2871_vm6 = vcmp.eq.f32.partialorder %v618_v60, 8.507059e+37  ;;  %v320_v12 = vsub.f32 %v2542_v8, %v2835_v54  ;;  %v328_v34 = vsub.f32 %v2681_v36, %v2835_v54 }
  0x90   : > { %1465 = vst [vmem:[%s2866_s16] sm:$0xff] %v1401_v51  ;;  %1876 = vrcp.f32 %v2852_v1  ;;  %v978_v15 = vand.u32 2147483648, %v2852_v1  ;;  %vm972_vm7 = vweird.f32 %v2852_v1  ;;  %v976_v45 = vand.u32 2147483647, %v2852_v1 }
  0x91   : > { %v1873_v30 = vpop.eup %1872  ;;  %1467 = vst [vmem:[%s2866_s16 + $0x10] sm:$0xff] %v1403_v24  ;;  %v649_v10 = vor.u32 1.1754944e-38, %v648_v41  ;;  %v336_v33 = vsub.f32 %v2734_v20, %v2835_v54  ;;  %vm2887_vm9 = vcmp.eq.f32.partialorder %v646_v21, 8.507059e+37  ;;  %v344_v36 = vsub.f32 %v2762_v5, %v2835_v54 }
  0x92   : > { %v2884_v60 = vor.u32 1.1754944e-38, %v978_v15  ;;  %v610_v48 = vmul.f32 %v1873_v30, %v2827_v62  ;;  %vm615_vm8 = vweird.f32 %v1873_v30  ;;  %v352_v24 = vsub.f32 %v2778_v55, %v2835_v54 }
  0x93   : > { %v1875_v51 = vpop.eup %1874  ;;  %v360_v41 = vsub.f32 %v2791_v29, %v2835_v54  ;;  %v368_v20 = vsub.f32 %v2808_v56, %v2835_v54  ;;  %v383_v15 = vmul.f32 1.442695, %v312_v57  ;;  %1878 = vpow2.f32 %v395_v47  ;;  %vm2911_vm13 = vmor %vm614_vm4, %vm615_vm8 }
  0x94   : > { %v611_v44 = vsub.f32 1.0, %v610_v48  ;;  %v638_v21 = vmul.f32 %v1875_v51, %v2838_v0  ;;  %vm643_vm10 = vweird.f32 %v1875_v51  ;;  %vm2900_vm11 = vcmp.eq.f32.partialorder %v976_v45, 8.507059e+37 }
  0x95   : > { %1880 = vpow2.f32 %v383_v15  ;;  %v399_v5 = vmul.f32 1.442695, %v320_v12  ;;  %v415_v3 = vmul.f32 1.442695, %v328_v34  ;;  %v4126_v55 = vsub.f32 %v2504_v11, %v2768_v19  ;;  %vm2921_vm14 = vmor %vm642_vm5, %vm643_vm10 }
  0x96   : > { %v1877_v39 = vpop.eup %1876  ;;  %v612_v43 = vmul.f32 %v1873_v30, %v611_v44  ;;  %v639_v54 = vsub.f32 1.0, %v638_v21  ;;  %1882 = vpow2.f32 %v411_v38  ;;  %v431_v56 = vmul.f32 1.442695, %v336_v33 }
  0x97   : > { %v427_v29 = vmul.f32 1.442695, %v4126_v55  ;;  %v968_v57 = vmul.f32 %v1877_v39, %v2852_v1  ;;  %vm973_vm12 = vweird.f32 %v1877_v39  ;;  %1884 = vpow2.f32 %v399_v5 }
  0x98   : > { %v4129_v11 = vsub.f32 %v2548_v50, %v2768_v19  ;;  %v613_v34 = vadd.f32 %v1873_v30, %v612_v43  ;;  %v640_v44 = vmul.f32 %v1875_v51, %v639_v54  ;;  %1886 = vpow2.f32 %v415_v3  ;;  %vm2947_vm15 = vmor %vm972_vm7, %vm973_vm12 }
  0x99   : > { %v447_v38 = vmul.f32 1.442695, %v344_v36  ;;  %v969_v45 = vsub.f32 1.0, %v968_v57  ;;  %1888 = vpow2.f32 %v427_v29  ;;  %v4132_v62 = vsub.f32 %v2664_v7, %v2768_v19  ;;  %v2928_v50 = vpop.eup %1878 }
  0x9a   : > { %v443_v12 = vmul.f32 1.442695, %v4129_v11  ;;  %v463_v15 = vmul.f32 1.442695, %v352_v24  ;;  %v617_v3 = vsel %vm2911_vm13, %v1873_v30, %v613_v34  ;;  %v641_v43 = vadd.f32 %v1875_v51, %v640_v44 }
  0x9b   : > { %v459_v48 = vmul.f32 1.442695, %v4132_v62  ;;  %1890 = vpow2.f32 %v431_v56  ;;  %v4133_v0 = vsub.f32 %v2684_v16, %v2768_v19  ;;  %v2935_v21 = vpop.eup %1880  ;;  %v970_v5 = vmul.f32 %v1877_v39, %v969_v45 }
  0x9c   : > { %v2940_v7 = vsel %vm2871_vm6, %v2857_v31, %v617_v3  ;;  %1892 = vpow2.f32 %v443_v12  ;;  %v479_v24 = vmul.f32 1.442695, %v360_v41  ;;  %v2942_v55 = vpop.eup %1882  ;;  %v645_v16 = vsel %vm2921_vm14, %v1875_v51, %v641_v43 }
  0x9d   : > { %v475_v36 = vmul.f32 1.442695, %v4133_v0  ;;  %v2955_v29 = vmul.f32 %v2666_v26, %v2940_v7  ;;  %1894 = vpow2.f32 %v447_v38  ;;  %v4136_v31 = vsub.f32 %v2737_v23, %v2768_v19  ;;  %v2960_v41 = vpop.eup %1884 }
  0x9e   : > { %v971_v54 = vadd.f32 %v1877_v39, %v970_v5  ;;  %v2964_v1 = vsel %vm2887_vm9, %v649_v10, %v645_v16  ;;  %1896 = vpow2.f32 %v459_v48  ;;  %v495_v56 = vmul.f32 1.442695, %v368_v20  ;;  %v2966_v57 = vpop.eup %1886 }
  0x9f   : > { %v491_v28 = vmul.f32 1.442695, %v4136_v31  ;;  %v2970_v26 = vmul.f32 %v2669_v6, %v2964_v1  ;;  %1898 = vpow2.f32 %v463_v15  ;;  %v532_v23 = vadd.f32 %v2928_v50, %v2862_v27  ;;  %v2976_v51 = vpop.eup %1888 }
  0xa0   : > { %v546_v19 = vadd.f32 %v2960_v41, %v2935_v21  ;;  %v975_v10 = vsel %vm2947_vm15, %v1877_v39, %v971_v54  ;;  %1900 = vpow2.f32 %v475_v36  ;;  %v2982_v8 = vmul.f32 %v2373_v4, %v2607_v42 }
  0xa1   : > { %v2986_v6 = vmul.f32 %v2384_v13, %v2616_v53  ;;  %v2988_v20 = vpop.eup %1890  ;;  %v980_v47 = vsel %vm2900_vm11, %v2884_v60, %v975_v10  ;;  %v743_v11 = vadd.f32 %v2970_v26, %v2955_v29  ;;  %1902 = vpow2.f32 %v479_v24 }
  0xa2   : > { %v533_v39 = vadd.f32 %v2942_v55, %v532_v23  ;;  %v2996_v12 = vpop.eup %1892  ;;  %v1402_v4 = vmul.f32 %v980_v47, %v2748_v37  ;;  %v1404_v13 = vmul.f32 %v980_v47, %v2757_v58  ;;  %1904 = vpow2.f32 %v491_v28 }
  0xa3   : > { %4137 = vst [vmem:[#allocation40_spill] sm:$0xff] %v2996_v12  ;;  %v547_v34 = vadd.f32 %v2966_v57, %v546_v19  ;;  %v3001_v44 = vpop.eup %1894  ;;  %v744_v40 = vrot.slane %v743_v11, 4  ;;  %1906 = vpow2.f32 %v495_v56  ;;  %v757_v38 = vadd.f32 %v2986_v6, %v2982_v8 }
  0xa4   : > { %4138 = vst [vmem:[#allocation41_spill] sm:$0xff] %v3001_v44  ;;  %v534_v60 = vadd.f32 %v2976_v51, %v533_v39  ;;  %v3006_v45 = vpop.eup %1896  ;;  %v3012_v58 = vmul.f32 %v2483_v46, %v2727_v25  ;;  %v3016_v33 = vmul.f32 %v2486_v59, %v2744_v49  ;;  %v3020_v62 = vmul.f32 %v2678_v52, %v2940_v7 }
  0xa5   : > { %4139 = vst [vmem:[#allocation42_spill] sm:$0xff] %v3006_v45  ;;  %v548_v37 = vadd.f32 %v2988_v20, %v547_v34  ;;  %v3022_v48 = vpop.eup %1898  ;;  %v745_v15 = vadd.f32 %v744_v40, %v743_v11  ;;  %v758_v43 = vrot.slane %v757_v38, 4  ;;  %v3028_v0 = vmul.f32 %v2688_v9, %v2964_v1 }
  0xa6   : > { %1466 = vst [vmem:[%s2866_s16 + $0x8] sm:$0xff] %v1402_v4  ;;  %v535_v3 = vadd.f32 %v2996_v12, %v534_v60  ;;  %v3030_v46 = vpop.eup %1900  ;;  %v764_v36 = vadd.f32 %v3016_v33, %v3012_v58  ;;  %v3049_v39 = vmul.f32 %v2392_v18, %v2607_v42  ;;  %v3053_v4 = vmul.f32 %v2400_v14, %v2616_v53 }
  0xa7   : > { %4140 = vst [vmem:[#allocation43_spill] sm:$0xff] %v3022_v48  ;;  %v549_v59 = vadd.f32 %v3001_v44, %v548_v37  ;;  %v3035_v52 = vpop.eup %1902  ;;  %v746_v5 = vrot.slane %v745_v15, 2  ;;  %v759_v30 = vadd.f32 %v758_v43, %v757_v38  ;;  %v771_v16 = vadd.f32 %v3028_v0, %v3020_v62 }
  0xa8   : > { %1468 = vst [vmem:[%s2866_s16 + $0x18] sm:$0xff] %v1404_v13  ;;  %v536_v24 = vadd.f32 %v3006_v45, %v535_v3  ;;  %v3040_v31 = vpop.eup %1904  ;;  %v765_v28 = vrot.slane %v764_v36, 4  ;;  %v785_v18 = vadd.f32 %v3053_v4, %v3049_v39 }
  0xa9   : > { %4141 = vst [vmem:[#allocation44_spill] sm:$0xff] %v3030_v46  ;;  %v550_v9 = vadd.f32 %v3022_v48, %v549_v59  ;;  %v3043_v54 = vpop.eup %1906  ;;  %v747_v56 = vadd.f32 %v746_v5, %v745_v15  ;;  %v760_v19 = vrot.slane %v759_v30, 2  ;;  %v772_v10 = vrot.slane %v771_v16, 4 }
  0xaa   : > { %4142 = vst [vmem:[#allocation45_spill] sm:$0xff] %v3035_v52  ;;  %v537_v23 = vadd.f32 %v3030_v46, %v536_v24  ;;  %v766_v11 = vadd.f32 %v765_v28, %v764_v36  ;;  %v3068_v59 = vmul.f32 %v2492_v2, %v2727_v25 }
  0xab   : > { %4143 = vst [vmem:[#allocation46_spill] sm:$0xff] %v3040_v31  ;;  %v551_v47 = vadd.f32 %v3035_v52, %v550_v9  ;;  %v748_v13 = vrot.slane %v747_v56, 1  ;;  %v761_v60 = vadd.f32 %v760_v19, %v759_v30  ;;  %v773_v15 = vadd.f32 %v772_v10, %v771_v16 }
  0xac   : > { %4144 = vst [vmem:[#allocation47_spill] sm:$0xff] %v3043_v54  ;;  %v538_v34 = vadd.f32 %v3040_v31, %v537_v23  ;;  %v767_v37 = vrot.slane %v766_v11, 2  ;;  %v3081_v23 = vmul.f32 %v2498_v61, %v2744_v49 }
  0xad   : > { %v3057_v40 = vadd.f32 %v3043_v54, %v551_v47  ;;  %v3059_v38 = vadd.f32 %v748_v13, %v747_v56  ;;  %v762_v30 = vrot.slane %v761_v60, 1  ;;  %v774_v2 = vrot.slane %v773_v15, 2 }
  0xae   : > { %1908 = vrcp.f32 %v538_v34  ;;  %v632_v3 = vand.u32 2147483647, %v538_v34  ;;  %v634_v43 = vand.u32 2147483648, %v538_v34  ;;  %vm628_vm1 = vweird.f32 %v538_v34 }
  0xaf   : > { %1910 = vrcp.f32 %v3057_v40  ;;  %v660_v14 = vand.u32 2147483647, %v3057_v40  ;;  %vm986_vm0 = vweird.f32 %v3059_v38  ;;  %v990_v36 = vand.u32 2147483647, %v3059_v38 }
  0xb0   : > { %1912 = vrcp.f32 %v3059_v38  ;;  %vm656_vm2 = vweird.f32 %v3057_v40  ;;  %v992_v5 = vand.u32 2147483648, %v3059_v38  ;;  %v635_v24 = vor.u32 1.1754944e-38, %v634_v43 }
  0xb1   : > { %v768_v16 = vadd.f32 %v767_v37, %v766_v11  ;;  %vm3074_vm3 = vcmp.eq.f32.partialorder %v632_v3, 8.507059e+37  ;;  %v662_v28 = vand.u32 2147483648, %v3057_v40  ;;  %v786_v56 = vrot.slane %v785_v18, 4 }
  0xb2   : > { %vm3083_vm4 = vcmp.eq.f32.partialorder %v660_v14, 8.507059e+37  ;;  %v3087_v47 = vadd.f32 %v762_v30, %v761_v60  ;;  %v3091_v13 = vmul.f32 %v2703_v17, %v2940_v7  ;;  %v3095_v37 = vmul.f32 %v2712_v35, %v2964_v1 }
  0xb3   : > { %v769_v11 = vrot.slane %v768_v16, 1  ;;  %vm3097_vm5 = vcmp.eq.f32.partialorder %v990_v36, 8.507059e+37  ;;  %v775_v14 = vadd.f32 %v774_v2, %v773_v15  ;;  %v787_v54 = vadd.f32 %v786_v56, %v785_v18 }
  0xb4   : > { %v1909_v19 = vpop.eup %1908  ;;  %1914 = vrcp.f32 %v3087_v47  ;;  %v792_v15 = vadd.f32 %v3081_v23, %v3068_v59  ;;  %vm1014_vm12 = vweird.f32 %v3087_v47 }
  0xb5   : > { %v1911_v3 = vpop.eup %1910  ;;  %v624_v43 = vmul.f32 %v1909_v19, %v538_v34  ;;  %vm629_vm6 = vweird.f32 %v1909_v19  ;;  %v3103_v17 = vadd.f32 %v769_v11, %v768_v16  ;;  %v776_v36 = vrot.slane %v775_v14, 1 }
  0xb6   : > { %v1913_v60 = vpop.eup %1912  ;;  %v652_v30 = vmul.f32 %v1911_v3, %v3057_v40  ;;  %vm657_vm7 = vweird.f32 %v1911_v3  ;;  %v788_v46 = vrot.slane %v787_v54, 2  ;;  %v3113_v16 = vadd.f32 %v3095_v37, %v3091_v13  ;;  %vm3117_vm9 = vmor %vm628_vm1, %vm629_vm6 }
  0xb7   : > { %v982_v35 = vmul.f32 %v1913_v60, %v3059_v38  ;;  %vm987_vm8 = vweird.f32 %v1913_v60  ;;  %v625_v31 = vsub.f32 1.0, %v624_v43  ;;  %1916 = vrcp.f32 %v3103_v17  ;;  %vm3126_vm10 = vmor %vm656_vm2, %vm657_vm7 }
  0xb8   : > { %v653_v52 = vsub.f32 1.0, %v652_v30  ;;  %v3109_v56 = vadd.f32 %v776_v36, %v775_v14  ;;  %v993_v11 = vor.u32 1.1754944e-38, %v992_v5  ;;  %v3121_v48 = vadd.f32 %v788_v46, %v787_v54  ;;  %vm3134_vm11 = vmor %vm986_vm0, %vm987_vm8 }
  0xb9   : > { %v983_v18 = vsub.f32 1.0, %v982_v35  ;;  %v626_v2 = vmul.f32 %v1909_v19, %v625_v31  ;;  %v793_v45 = vrot.slane %v792_v15, 4  ;;  %v663_v5 = vor.u32 1.1754944e-38, %v662_v28 }
  0xba   : > { %v654_v30 = vmul.f32 %v1911_v3, %v653_v52  ;;  %1918 = vrcp.f32 %v3109_v56  ;;  %v1915_v34 = vpop.eup %1914  ;;  %v790_v54 = vrot.slane %v3121_v48, 1  ;;  %v800_v40 = vrot.slane %v3113_v16, 4 }
  0xbb   : > { %v984_v44 = vmul.f32 %v1913_v60, %v983_v18  ;;  %v627_v35 = vadd.f32 %v1909_v19, %v626_v2  ;;  %v3139_v14 = vadd.f32 %v793_v45, %v792_v15  ;;  %v1010_v18 = vmul.f32 %v1915_v34, %v3087_v47 }
  0xbc   : > { %v655_v52 = vadd.f32 %v1911_v3, %v654_v30  ;;  %v1020_v2 = vand.u32 2147483648, %v3087_v47  ;;  %vm1015_vm13 = vweird.f32 %v1915_v34  ;;  %v1018_v15 = vand.u32 2147483647, %v3087_v47 }
  0xbd   : > { %v985_v36 = vadd.f32 %v1913_v60, %v984_v44  ;;  %v631_v28 = vsel %vm3117_vm9, %v1909_v19, %v627_v35  ;;  %v1917_v38 = vpop.eup %1916  ;;  %vm3178_vm14 = vmor %vm1014_vm12, %vm1015_vm13  ;;  %vm1028_vm0 = vweird.f32 %v3103_v17  ;;  %v1034_v46 = vand.u32 2147483648, %v3103_v17 }
  0xbe   : > { %v3148_v12 = vsel %vm3074_vm3, %v635_v24, %v631_v28  ;;  %v659_v30 = vsel %vm3126_vm10, %v1911_v3, %v655_v52  ;;  %v1011_v24 = vsub.f32 1.0, %v1010_v18  ;;  %v1024_v31 = vmul.f32 %v1917_v38, %v3103_v17 }
  0xbf   : > { %v989_v44 = vsel %vm3134_vm11, %v1913_v60, %v985_v36  ;;  %v3157_v45 = vsel %vm3083_vm4, %v663_v5, %v659_v30  ;;  %v3161_v19 = vmul.f32 %v2862_v27, %v3148_v12  ;;  %v1021_v60 = vor.u32 1.1754944e-38, %v1020_v2 }
  0xc0   : > { %v994_v9 = vsel %vm3097_vm5, %v993_v11, %v989_v44  ;;  %v3167_v3 = vmul.f32 %v2935_v21, %v3157_v45  ;;  %v1919_v43 = vpop.eup %1918  ;;  %v1012_v27 = vmul.f32 %v1915_v34, %v1011_v24  ;;  %vm3182_vm15 = vcmp.eq.f32.partialorder %v1018_v15, 8.507059e+37 }
  0xc1   : > { %v1405_v10 = vmul.f32 %v994_v9, %v2955_v29  ;;  %v1407_v35 = vmul.f32 %v994_v9, %v2970_v26  ;;  %vm1029_vm1 = vweird.f32 %v1917_v38  ;;  %v1025_v26 = vsub.f32 1.0, %v1024_v31 }
  0xc2   : > { %v750_v61 = vadd.f32 %v3167_v3, %v3161_v19  ;;  %v1013_v29 = vadd.f32 %v1915_v34, %v1012_v27  ;;  %v1032_v5 = vand.u32 2147483647, %v3103_v17  ;;  %v1038_v47 = vmul.f32 %v1919_v43, %v3109_v56  ;;  %vm3204_vm5 = vmor %vm1028_vm0, %vm1029_vm1 }
  0xc3   : > { %1469 = vst [vmem:[%s2866_s16 + $0x20] sm:$0xff] %v1405_v10  ;;  %vm1042_vm2 = vweird.f32 %v3109_v56  ;;  %vm1043_vm3 = vweird.f32 %v1919_v43  ;;  %v1026_v28 = vmul.f32 %v1917_v38, %v1025_v26  ;;  %v1035_v2 = vor.u32 1.1754944e-38, %v1034_v46 }
  0xc4   : > { %v751_v52 = vrot.slane %v750_v61, 4  ;;  %1471 = vst [vmem:[%s2866_s16 + $0x30] sm:$0xff] %v1407_v35  ;;  %v1017_v36 = vsel %vm3178_vm14, %v1915_v34, %v1013_v29  ;;  %vm3195_vm4 = vcmp.eq.f32.partialorder %v1032_v5, 8.507059e+37  ;;  %v1039_v9 = vsub.f32 1.0, %v1038_v47  ;;  %vm3226_vm7 = vmor %vm1042_vm2, %vm1043_vm3 }
  0xc5   : > { %v1022_v44 = vsel %vm3182_vm15, %v1021_v60, %v1017_v36  ;;  %v1046_v34 = vand.u32 2147483647, %v3109_v56  ;;  %v1027_v10 = vadd.f32 %v1917_v38, %v1026_v28  ;;  %v1048_v27 = vand.u32 2147483648, %v3109_v56 }
  0xc6   : > { %v752_v30 = vadd.f32 %v751_v52, %v750_v61  ;;  %v1409_v15 = vmul.f32 %v1022_v44, %v2982_v8  ;;  %v1411_v35 = vmul.f32 %v1022_v44, %v2986_v6  ;;  %v1040_v60 = vmul.f32 %v1919_v43, %v1039_v9 }
  0xc7   : > { %vm3212_vm6 = vcmp.eq.f32.partialorder %v1046_v34, 8.507059e+37  ;;  %v3218_v17 = vmul.f32 %v2928_v50, %v3148_v12  ;;  %v1031_v8 = vsel %vm3204_vm5, %v1917_v38, %v1027_v10  ;;  %v1049_v21 = vor.u32 1.1754944e-38, %v1048_v27 }
  0xc8   : > { %v753_v31 = vrot.slane %v752_v30, 2  ;;  %1473 = vst [vmem:[%s2866_s16 + $0x40] sm:$0xff] %v1409_v15  ;;  %v3232_v11 = vmul.f32 %v2960_v41, %v3157_v45  ;;  %v791_v50 = vadd.f32 %v790_v54, %v3121_v48  ;;  %v1036_v26 = vsel %vm3195_vm4, %v1035_v2, %v1031_v8 }
  0xc9   : > { %1475 = vst [vmem:[%s2866_s16 + $0x50] sm:$0xff] %v1411_v35  ;;  %v1041_v38 = vadd.f32 %v1919_v43, %v1040_v60  ;;  %v795_v56 = vrot.slane %v3139_v14, 2  ;;  %v1410_v5 = vmul.f32 %v1036_v26, %v3012_v58  ;;  %v1412_v46 = vmul.f32 %v1036_v26, %v3016_v33 }
  0xca   : > { %v754_v29 = vadd.f32 %v753_v31, %v752_v30  ;;  %v778_v52 = vadd.f32 %v3232_v11, %v3218_v17  ;;  %1920 = vrcp.f32 %v791_v50  ;;  %v1074_v54 = vand.u32 2147483647, %v791_v50 }
  0xcb   : > { %v1045_v48 = vsel %vm3226_vm7, %v1919_v43, %v1041_v38  ;;  %1474 = vst [vmem:[%s2866_s16 + $0x48] sm:$0xff] %v1410_v5  ;;  %v796_v28 = vadd.f32 %v795_v56, %v3139_v14  ;;  %v1076_v2 = vand.u32 2147483648, %v791_v50  ;;  %v801_v44 = vadd.f32 %v800_v40, %v3113_v16 }
  0xcc   : > { %v755_v41 = vrot.slane %v754_v29, 1  ;;  %v1050_v47 = vsel %vm3212_vm6, %v1049_v21, %v1045_v48  ;;  %v779_v36 = vrot.slane %v778_v52, 4  ;;  %1476 = vst [vmem:[%s2866_s16 + $0x58] sm:$0xff] %v1412_v46  ;;  %v3259_v24 = vmul.f32 %v2407_v22, %v2607_v42 }
  0xcd   : > { %v1413_v33 = vmul.f32 %v1050_v47, %v3020_v62  ;;  %v1415_v18 = vmul.f32 %v1050_v47, %v3028_v0  ;;  %v797_v43 = vrot.slane %v796_v28, 1  ;;  %vm1070_vm8 = vweird.f32 %v791_v50  ;;  %v4171_v62 = vld [vmem:[#allocation13_spill] sm:$0xff] }
  0xce   : > { %v3249_v58 = vadd.f32 %v755_v41, %v754_v29  ;;  %v780_v30 = vadd.f32 %v779_v36, %v778_v52  ;;  %vm3263_vm9 = vcmp.eq.f32.partialorder %v1074_v54, 8.507059e+37  ;;  %v3269_v0 = vmul.f32 %v4171_v62, %v2616_v53  ;;  %v4176_v54 = vld [vmem:[#allocation22_spill] sm:$0xff] }
  0xcf   : > { %1477 = vst [vmem:[%s2866_s16 + $0x60] sm:$0xff] %v1413_v33  ;;  %v3273_v40 = vadd.f32 %v797_v43, %v796_v28  ;;  %v802_v22 = vrot.slane %v801_v44, 2  ;;  %v1077_v35 = vor.u32 1.1754944e-38, %v1076_v2  ;;  %v3278_v27 = vmul.f32 %v2942_v55, %v3148_v12 }
  0xd0   : > { %1922 = vrcp.f32 %v3249_v58  ;;  %v1921_v9 = vpop.eup %1920  ;;  %v1004_v34 = vand.u32 2147483647, %v3249_v58  ;;  %v781_v16 = vrot.slane %v780_v30, 2  ;;  %1479 = vst [vmem:[%s2866_s16 + $0x70] sm:$0xff] %v1415_v18  ;;  %v1006_v15 = vand.u32 2147483648, %v3249_v58 }
  0xd1   : > { %v1066_v10 = vmul.f32 %v1921_v9, %v791_v50  ;;  %vm1071_vm10 = vweird.f32 %v1921_v9  ;;  %1924 = vrcp.f32 %v3273_v40  ;;  %v1088_v60 = vand.u32 2147483647, %v3273_v40 }
  0xd2   : > { %v782_v31 = vadd.f32 %v781_v16, %v780_v30  ;;  %v1090_v8 = vand.u32 2147483648, %v3273_v40  ;;  %v803_v6 = vadd.f32 %v802_v22, %v801_v44  ;;  %v3285_v21 = vmul.f32 %v2966_v57, %v3157_v45  ;;  %vm3301_vm13 = vmor %vm1070_vm8, %vm1071_vm10 }
  0xd3   : > { %v1067_v61 = vsub.f32 1.0, %v1066_v10  ;;  %vm1000_vm11 = vweird.f32 %v3249_v58  ;;  %vm3288_vm12 = vcmp.eq.f32.partialorder %v1004_v34, 8.507059e+37  ;;  %v813_v26 = vadd.f32 %v3269_v0, %v3259_v24 }
  0xd4   : > { %v783_v55 = vrot.slane %v782_v31, 1  ;;  %v1007_v56 = vor.u32 1.1754944e-38, %v1006_v15  ;;  %v804_v46 = vrot.slane %v803_v6, 1  ;;  %v806_v52 = vadd.f32 %v3285_v21, %v3278_v27 }
  0xd5   : > { %v1068_v5 = vmul.f32 %v1921_v9, %v1067_v61  ;;  %vm1084_vm14 = vweird.f32 %v3273_v40  ;;  %v3308_v47 = vmul.f32 %v4176_v54, %v2727_v25  ;;  %vm3310_vm0 = vcmp.eq.f32.partialorder %v1088_v60, 8.507059e+37 }
  0xd6   : > { %v1923_v38 = vpop.eup %1922  ;;  %v3297_v41 = vadd.f32 %v783_v55, %v782_v31  ;;  %v1091_v33 = vor.u32 1.1754944e-38, %v1090_v8  ;;  %v3314_v18 = vadd.f32 %v804_v46, %v803_v6  ;;  %v807_v30 = vrot.slane %v806_v52, 4  ;;  %v4187_v31 = vld [vmem:[#allocation31_spill] sm:$0xff] }
  0xd7   : > { %v996_v57 = vmul.f32 %v1923_v38, %v3249_v58  ;;  %vm1001_vm15 = vweird.f32 %v1923_v38  ;;  %v1069_v36 = vadd.f32 %v1921_v9, %v1068_v5  ;;  %v1925_v50 = vpop.eup %1924  ;;  %v814_v43 = vrot.slane %v813_v26, 4 }
  0xd8   : > { %1926 = vrcp.f32 %v3297_v41  ;;  %v1060_v44 = vand.u32 2147483647, %v3297_v41  ;;  %v1062_v62 = vand.u32 2147483648, %v3297_v41  ;;  %v1080_v16 = vmul.f32 %v1925_v50, %v3273_v40  ;;  %vm3332_vm1 = vmor %vm1000_vm11, %vm1001_vm15 }
  0xd9   : > { %v997_v2 = vsub.f32 1.0, %v996_v57  ;;  %v1073_v34 = vsel %vm3301_vm13, %v1921_v9, %v1069_v36  ;;  %1928 = vrcp.f32 %v3314_v18  ;;  %v3327_v10 = vmul.f32 %v2529_v63, %v2744_v49 }
  0xda   : > { %v1078_v15 = vsel %vm3263_vm9, %v1077_v35, %v1073_v34  ;;  %v1081_v60 = vsub.f32 1.0, %v1080_v16  ;;  %vm1085_vm2 = vweird.f32 %v1925_v50  ;;  %vm1056_vm3 = vweird.f32 %v3297_v41 }
  0xdb   : > { %v998_v22 = vmul.f32 %v1923_v38, %v997_v2  ;;  %v1417_v9 = vmul.f32 %v1078_v15, %v3049_v39  ;;  %v1419_v14 = vmul.f32 %v1078_v15, %v3053_v4  ;;  %v1063_v61 = vor.u32 1.1754944e-38, %v1062_v62  ;;  %vm3350_vm6 = vmor %vm1084_vm14, %vm1085_vm2 }
  0xdc   : > { %vm1098_vm4 = vweird.f32 %v3314_v18  ;;  %vm3340_vm5 = vcmp.eq.f32.partialorder %v1060_v44, 8.507059e+37  ;;  %v1082_v58 = vmul.f32 %v1925_v50, %v1081_v60  ;;  %v1102_v8 = vand.u32 2147483647, %v3314_v18 }
  0xdd   : > { %v999_v35 = vadd.f32 %v1923_v38, %v998_v22  ;;  %1481 = vst [vmem:[%s2866_s16 + $0x80] sm:$0xff] %v1417_v9  ;;  %v808_v39 = vadd.f32 %v807_v30, %v806_v52  ;;  %v815_v6 = vadd.f32 %v814_v43, %v813_v26  ;;  %v1104_v46 = vand.u32 2147483648, %v3314_v18 }
  0xde   : > { %v1927_v55 = vpop.eup %1926  ;;  %1483 = vst [vmem:[%s2866_s16 + $0x90] sm:$0xff] %v1419_v14  ;;  %v820_v57 = vadd.f32 %v3327_v10, %v3308_v47  ;;  %v3360_v26 = vmul.f32 %v2723_v32, %v2940_v7  ;;  %v1083_v52 = vadd.f32 %v1925_v50, %v1082_v58  ;;  %v3385_v9 = vmul.f32 %v4187_v31, %v2964_v1 }
  0xdf   : > { %v1003_v4 = vsel %vm3332_vm1, %v1923_v38, %v999_v35  ;;  %v1052_v40 = vmul.f32 %v1927_v55, %v3297_v41  ;;  %vm1057_vm7 = vweird.f32 %v1927_v55  ;;  %v1929_v48 = vpop.eup %1928  ;;  %v809_v2 = vrot.slane %v808_v39, 2 }
  0xe0   : > { %v1008_v38 = vsel %vm3288_vm12, %v1007_v56, %v1003_v4  ;;  %v816_v30 = vrot.slane %v815_v6, 2  ;;  %v1087_v32 = vsel %vm3350_vm6, %v1925_v50, %v1083_v52  ;;  %v1094_v44 = vmul.f32 %v1929_v48, %v3314_v18  ;;  %vm3379_vm9 = vmor %vm1056_vm3, %vm1057_vm7  ;;  %v4190_v52 = vld [vmem:[#allocation14_spill] sm:$0xff] }
  0xe1   : > { %v1406_v54 = vmul.f32 %v1008_v38, %v3161_v19  ;;  %v1408_v36 = vmul.f32 %v1008_v38, %v3167_v3  ;;  %v1053_v43 = vsub.f32 1.0, %v1052_v40  ;;  %vm1099_vm8 = vweird.f32 %v1929_v48 }
  0xe2   : > { %v1092_v29 = vsel %vm3310_vm0, %v1091_v33, %v1087_v32  ;;  %v810_v56 = vadd.f32 %v809_v2, %v808_v39  ;;  %v817_v62 = vadd.f32 %v816_v30, %v815_v6  ;;  %v821_v34 = vrot.slane %v820_v57, 4  ;;  %vm3400_vm10 = vmor %vm1098_vm4, %vm1099_vm8  ;;  %v4193_v2 = vld [vmem:[#allocation15_spill] sm:$0xff]  ;;  %v4195_v32 = vld [vmem:[#allocation24_spill] sm:$0xff] }
  0xe3   : > { %1470 = vst [vmem:[%s2866_s16 + $0x28] sm:$0xff] %v1406_v54  ;;  %v1054_v19 = vmul.f32 %v1927_v55, %v1053_v43  ;;  %v1418_v3 = vmul.f32 %v1092_v29, %v3068_v59  ;;  %v1420_v16 = vmul.f32 %v1092_v29, %v3081_v23  ;;  %v1095_v22 = vsub.f32 1.0, %v1094_v44 }
  0xe4   : > { %1472 = vst [vmem:[%s2866_s16 + $0x38] sm:$0xff] %v1408_v36  ;;  %v811_v28 = vrot.slane %v810_v56, 1  ;;  %v818_v33 = vrot.slane %v817_v62, 1  ;;  %v822_v15 = vadd.f32 %v821_v34, %v820_v57  ;;  %v3390_v23 = vmul.f32 %v2976_v51, %v3148_v12 }
  0xe5   : > { %v1055_v60 = vadd.f32 %v1927_v55, %v1054_v19  ;;  %1482 = vst [vmem:[%s2866_s16 + $0x88] sm:$0xff] %v1418_v3  ;;  %v1096_v59 = vmul.f32 %v1929_v48, %v1095_v22  ;;  %v3394_v41 = vmul.f32 %v2988_v20, %v3157_v45  ;;  %v1105_v35 = vor.u32 1.1754944e-38, %v1104_v46 }
  0xe6   : > { %1484 = vst [vmem:[%s2866_s16 + $0x98] sm:$0xff] %v1420_v16  ;;  %v812_v58 = vadd.f32 %v811_v28, %v810_v56  ;;  %v3404_v39 = vadd.f32 %v818_v33, %v817_v62  ;;  %vm1103_vm11 = vcmp.eq.f32.partialorder %v1102_v8, 8.507059e+37  ;;  %v823_v20 = vrot.slane %v822_v15, 2 }
  0xe7   : > { %v1059_v51 = vsel %vm3379_vm9, %v1927_v55, %v1055_v60  ;;  %v1097_v6 = vadd.f32 %v1929_v48, %v1096_v59  ;;  %v827_v18 = vadd.f32 %v3385_v9, %v3360_v26  ;;  %v834_v5 = vadd.f32 %v3394_v41, %v3390_v23 }
  0xe8   : > { %v1064_v4 = vsel %vm3340_vm5, %v1063_v61, %v1059_v51  ;;  %1930 = vrcp.f32 %v812_v58  ;;  %v1116_v55 = vand.u32 2147483647, %v812_v58  ;;  %v1118_v63 = vand.u32 2147483648, %v812_v58 }
  0xe9   : > { %v1414_v46 = vmul.f32 %v1064_v4, %v3218_v17  ;;  %v1416_v57 = vmul.f32 %v1064_v4, %v3232_v11  ;;  %v1101_v8 = vsel %vm3400_vm10, %v1929_v48, %v1097_v6  ;;  %1932 = vrcp.f32 %v3404_v39 }
  0xea   : > { %v1106_v38 = vsel %vm1103_vm11, %v1105_v35, %v1101_v8  ;;  %v3424_v17 = vmul.f32 %v4190_v52, %v2607_v42  ;;  %vm1112_vm12 = vweird.f32 %v812_v58  ;;  %v824_v11 = vadd.f32 %v823_v20, %v822_v15  ;;  %v4200_v8 = vld [vmem:[#allocation32_spill] sm:$0xff] }
  0xeb   : > { %1478 = vst [vmem:[%s2866_s16 + $0x68] sm:$0xff] %v1414_v46  ;;  %v1421_v61 = vmul.f32 %v1106_v38, %v3091_v13  ;;  %v1423_v40 = vmul.f32 %v1106_v38, %v3095_v37  ;;  %v828_v54 = vrot.slane %v827_v18, 4  ;;  %v835_v48 = vrot.slane %v834_v5, 4  ;;  %v4194_v37 = vld [vmem:[#allocation23_spill] sm:$0xff] }
  0xec   : > { %1480 = vst [vmem:[%s2866_s16 + $0x78] sm:$0xff] %v1416_v57  ;;  %vm3428_vm13 = vcmp.eq.f32.partialorder %v1116_v55, 8.507059e+37  ;;  %v1130_v13 = vand.u32 2147483647, %v3404_v39  ;;  %v3435_v30 = vmul.f32 %v4193_v2, %v2616_v53  ;;  %v3439_v43 = vmul.f32 %v4194_v37, %v2727_v25 }
  0xed   : > { %1485 = vst [vmem:[%s2866_s16 + $0xa0] sm:$0xff] %v1421_v61  ;;  %v3443_v44 = vmul.f32 %v4195_v32, %v2744_v49  ;;  %v1132_v56 = vand.u32 2147483648, %v3404_v39  ;;  %v825_v62 = vrot.slane %v824_v11, 1  ;;  %v829_v34 = vadd.f32 %v828_v54, %v827_v18 }
  0xee   : > { %v1931_v29 = vpop.eup %1930  ;;  %1487 = vst [vmem:[%s2866_s16 + $0xb0] sm:$0xff] %v1423_v40  ;;  %v836_v19 = vadd.f32 %v835_v48, %v834_v5  ;;  %v1119_v16 = vor.u32 1.1754944e-38, %v1118_v63  ;;  %vm1126_vm14 = vweird.f32 %v3404_v39  ;;  %v841_v22 = vadd.f32 %v3435_v30, %v3424_v17  ;;  %v4203_v48 = vld [vmem:[#allocation33_spill] sm:$0xff] }
  0xef   : > { %v1108_v3 = vmul.f32 %v1931_v29, %v812_v58  ;;  %v1933_v50 = vpop.eup %1932  ;;  %v826_v28 = vadd.f32 %v825_v62, %v824_v11  ;;  %v830_v33 = vrot.slane %v829_v34, 2  ;;  %v848_v31 = vadd.f32 %v3443_v44, %v3439_v43 }
  0xf0   : > { %v837_v15 = vrot.slane %v836_v19, 2  ;;  %vm1113_vm15 = vweird.f32 %v1931_v29  ;;  %v1122_v59 = vmul.f32 %v1933_v50, %v3404_v39  ;;  %v842_v14 = vrot.slane %v841_v22, 4 }
  0xf1   : > { %v1109_v60 = vsub.f32 1.0, %v1108_v3  ;;  %vm1127_vm0 = vweird.f32 %v1933_v50  ;;  %vm3453_vm1 = vcmp.eq.f32.partialorder %v1130_v13, 8.507059e+37  ;;  %v1133_v51 = vor.u32 1.1754944e-38, %v1132_v56  ;;  %vm3458_vm2 = vmor %vm1112_vm12, %vm1113_vm15 }
  0xf2   : > { %1934 = vrcp.f32 %v826_v28  ;;  %v1123_v20 = vsub.f32 1.0, %v1122_v59  ;;  %v831_v4 = vadd.f32 %v830_v33, %v829_v34  ;;  %v838_v18 = vadd.f32 %v837_v15, %v836_v19  ;;  %vm3469_vm4 = vmor %vm1126_vm14, %vm1127_vm0 }
  0xf3   : > { %v1110_v6 = vmul.f32 %v1931_v29, %v1109_v60  ;;  %vm1140_vm3 = vweird.f32 %v826_v28  ;;  %v843_v46 = vadd.f32 %v842_v14, %v841_v22  ;;  %v849_v57 = vrot.slane %v848_v31, 4 }
  0xf4   : > { %v3464_v55 = vmul.f32 %v4200_v8, %v2940_v7  ;;  %v1124_v61 = vmul.f32 %v1933_v50, %v1123_v20  ;;  %v832_v63 = vrot.slane %v831_v4, 1  ;;  %v839_v40 = vrot.slane %v838_v18, 1 }
  0xf5   : > { %v1111_v38 = vadd.f32 %v1931_v29, %v1110_v6  ;;  %v1144_v52 = vand.u32 2147483647, %v826_v28  ;;  %v844_v11 = vrot.slane %v843_v46, 2  ;;  %v850_v54 = vadd.f32 %v849_v57, %v848_v31 }
  0xf6   : > { %v3475_v13 = vmul.f32 %v4203_v48, %v2964_v1  ;;  %v1125_v37 = vadd.f32 %v1933_v50, %v1124_v61  ;;  %v1146_v32 = vand.u32 2147483648, %v826_v28  ;;  %v3479_v56 = vadd.f32 %v832_v63, %v831_v4 }
  0xf7   : > { %v1115_v2 = vsel %vm3458_vm2, %v1931_v29, %v1111_v38  ;;  %v3483_v34 = vadd.f32 %v839_v40, %v838_v18  ;;  %v845_v19 = vadd.f32 %v844_v11, %v843_v46  ;;  %v851_v3 = vrot.slane %v850_v54, 2  ;;  %v4208_v18 = vld [vmem:[#allocation40_spill] sm:$0xff]  ;;  %v4211_v40 = vld [vmem:[#allocation41_spill] sm:$0xff] }
  0xf8   : > { %v1935_v39 = vpop.eup %1934  ;;  %v1120_v62 = vsel %vm3428_vm13, %v1119_v16, %v1115_v2  ;;  %v1129_v29 = vsel %vm3469_vm4, %v1933_v50, %v1125_v37  ;;  %1936 = vrcp.f32 %v3479_v56  ;;  %v855_v36 = vadd.f32 %v3475_v13, %v3464_v55 }
  0xf9   : > { %v1422_v22 = vmul.f32 %v1120_v62, %v3278_v27  ;;  %v1424_v33 = vmul.f32 %v1120_v62, %v3285_v21  ;;  %v1136_v15 = vmul.f32 %v1935_v39, %v826_v28  ;;  %v1134_v31 = vsel %vm3453_vm1, %v1133_v51, %v1129_v29  ;;  %v4214_v29 = vld [vmem:[#allocation16_spill] sm:$0xff] }
  0xfa   : > { %vm1141_vm5 = vweird.f32 %v1935_v39  ;;  %v1425_v27 = vmul.f32 %v1134_v31, %v3259_v24  ;;  %v1427_v21 = vmul.f32 %v1134_v31, %v3269_v0  ;;  %v1158_v50 = vand.u32 2147483647, %v3479_v56  ;;  %v4215_v31 = vld [vmem:[#allocation17_spill] sm:$0xff] }
  0xfb   : > { %1486 = vst [vmem:[%s2866_s16 + $0xa8] sm:$0xff] %v1422_v22  ;;  %v1137_v16 = vsub.f32 1.0, %v1136_v15  ;;  %vm3499_vm6 = vcmp.eq.f32.partialorder %v1144_v52, 8.507059e+37  ;;  %v1147_v59 = vor.u32 1.1754944e-38, %v1146_v32  ;;  %v1160_v14 = vand.u32 2147483648, %v3479_v56  ;;  %vm3510_vm7 = vmor %vm1140_vm3, %vm1141_vm5 }
  0xfc   : > { %1488 = vst [vmem:[%s2866_s16 + $0xb8] sm:$0xff] %v1424_v33  ;;  %1938 = vrcp.f32 %v3483_v34  ;;  %v1172_v51 = vand.u32 2147483647, %v3483_v34  ;;  %v1174_v24 = vand.u32 2147483648, %v3483_v34  ;;  %v846_v6 = vrot.slane %v845_v19, 1 }
  0xfd   : > { %1489 = vst [vmem:[%s2866_s16 + $0xc0] sm:$0xff] %v1425_v27  ;;  %v1138_v35 = vmul.f32 %v1935_v39, %v1137_v16  ;;  %vm1154_vm8 = vweird.f32 %v3479_v56  ;;  %v852_v20 = vadd.f32 %v851_v3, %v850_v54  ;;  %v856_v4 = vrot.slane %v855_v36, 4  ;;  %v4236_v54 = vld [vmem:[#allocation18_spill] sm:$0xff] }
  0xfe   : > { %1491 = vst [vmem:[%s2866_s16 + $0xd0] sm:$0xff] %v1427_v21  ;;  %v3518_v5 = vmul.f32 %v4208_v18, %v3148_v12  ;;  %vm3520_vm9 = vcmp.eq.f32.partialorder %v1158_v50, 8.507059e+37  ;;  %vm1168_vm10 = vweird.f32 %v3483_v34  ;;  %v3525_v28 = vadd.f32 %v846_v6, %v845_v19  ;;  %v1937_v8 = vpop.eup %1936 }
  0xff   : > { %v1139_v46 = vadd.f32 %v1935_v39, %v1138_v35  ;;  %v1161_v38 = vor.u32 1.1754944e-38, %v1160_v14  ;;  %v1175_v61 = vor.u32 1.1754944e-38, %v1174_v24  ;;  %v853_v63 = vrot.slane %v852_v20, 1 }
 0x100   : > { %v3529_v58 = vmul.f32 %v4211_v40, %v3157_v45  ;;  %v1150_v11 = vmul.f32 %v1937_v8, %v3479_v56  ;;  %vm3534_vm11 = vcmp.eq.f32.partialorder %v1172_v51, 8.507059e+37  ;;  %1940 = vrcp.f32 %v3525_v28 }
 0x101   : > { %v1143_v52 = vsel %vm3510_vm7, %v1935_v39, %v1139_v46  ;;  %v857_v48 = vadd.f32 %v856_v4, %v855_v36  ;;  %vm1155_vm12 = vweird.f32 %v1937_v8  ;;  %v1186_v32 = vand.u32 2147483647, %v3525_v28 }
 0x102   : > { %v1939_v2 = vpop.eup %1938  ;;  %v1148_v37 = vsel %vm3499_vm6, %v1147_v59, %v1143_v52  ;;  %v1188_v39 = vand.u32 2147483648, %v3525_v28  ;;  %v1151_v3 = vsub.f32 1.0, %v1150_v11  ;;  %v3546_v33 = vadd.f32 %v853_v63, %v852_v20  ;;  %vm3563_vm14 = vmor %vm1154_vm8, %vm1155_vm12 }
 0x103   : > { %v1426_v62 = vmul.f32 %v1148_v37, %v3308_v47  ;;  %v1428_v19 = vmul.f32 %v1148_v37, %v3327_v10  ;;  %v1164_v22 = vmul.f32 %v1939_v2, %v3483_v34  ;;  %vm1169_vm13 = vweird.f32 %v1939_v2 }
 0x104   : > { %v3550_v15 = vmul.f32 %v4214_v29, %v2607_v42  ;;  %v3554_v36 = vmul.f32 %v4215_v31, %v2616_v53  ;;  %v1152_v27 = vmul.f32 %v1937_v8, %v1151_v3  ;;  %v858_v47 = vrot.slane %v857_v48, 2  ;;  %vm3576_vm1 = vmor %vm1168_vm10, %vm1169_vm13 }
 0x105   : > { %1490 = vst [vmem:[%s2866_s16 + $0xc8] sm:$0xff] %v1426_v62  ;;  %v1165_v16 = vsub.f32 1.0, %v1164_v22  ;;  %v862_v10 = vadd.f32 %v3529_v58, %v3518_v5  ;;  %vm1182_vm15 = vweird.f32 %v3525_v28  ;;  %vm3568_vm0 = vcmp.eq.f32.partialorder %v1186_v32, 8.507059e+37 }
 0x106   : > { %1492 = vst [vmem:[%s2866_s16 + $0xd8] sm:$0xff] %v1428_v19  ;;  %v1189_v60 = vor.u32 1.1754944e-38, %v1188_v39  ;;  %1942 = vrcp.f32 %v3546_v33  ;;  %v1941_v59 = vpop.eup %1940  ;;  %v1153_v14 = vadd.f32 %v1937_v8, %v1152_v27  ;;  %v859_v51 = vadd.f32 %v858_v47, %v857_v48 }
 0x107   : > { %v1166_v35 = vmul.f32 %v1939_v2, %v1165_v16  ;;  %v863_v24 = vrot.slane %v862_v10, 4  ;;  %v1178_v6 = vmul.f32 %v1941_v59, %v3525_v28  ;;  %vm1196_vm2 = vweird.f32 %v3546_v33  ;;  %v4227_v16 = vld [vmem:[#allocation26_spill] sm:$0xff] }
 0x108   : > { %v1200_v0 = vand.u32 2147483647, %v3546_v33  ;;  %v1202_v20 = vand.u32 2147483648, %v3546_v33  ;;  %v1157_v4 = vsel %vm3563_vm14, %v1937_v8, %v1153_v14  ;;  %v860_v46 = vrot.slane %v859_v51, 1 }
 0x109   : > { %v1167_v18 = vadd.f32 %v1939_v2, %v1166_v35  ;;  %v864_v63 = vadd.f32 %v863_v24, %v862_v10  ;;  %v1162_v34 = vsel %vm3520_vm9, %v1161_v38, %v1157_v4  ;;  %v1179_v40 = vsub.f32 1.0, %v1178_v6 }
 0x10a   : > { %vm1183_vm3 = vweird.f32 %v1941_v59  ;;  %v869_v52 = vadd.f32 %v3554_v36, %v3550_v15  ;;  %v1429_v11 = vmul.f32 %v1162_v34, %v3360_v26  ;;  %v1431_v8 = vmul.f32 %v1162_v34, %v3385_v9 }
 0x10b   : > { %v1171_v48 = vsel %vm3576_vm1, %v1939_v2, %v1167_v18  ;;  %v3594_v37 = vadd.f32 %v860_v46, %v859_v51  ;;  %v1180_v38 = vmul.f32 %v1941_v59, %v1179_v40  ;;  %v865_v39 = vrot.slane %v864_v63, 2  ;;  %vm3603_vm4 = vmor %vm1182_vm15, %vm1183_vm3 }
 0x10c   : > { %v1943_v32 = vpop.eup %1942  ;;  %v1176_v57 = vsel %vm3534_vm11, %v1175_v61, %v1171_v48  ;;  %v870_v62 = vrot.slane %v869_v52, 4  ;;  %1493 = vst [vmem:[%s2866_s16 + $0xe0] sm:$0xff] %v1429_v11  ;;  %vm3608_vm5 = vcmp.eq.f32.partialorder %v1200_v0, 8.507059e+37  ;;  %v1203_v27 = vor.u32 1.1754944e-38, %v1202_v20  ;;  %v4235_v11 = vld [vmem:[#allocation43_spill] sm:$0xff] }
 0x10d   : > { %v1430_v19 = vmul.f32 %v1176_v57, %v3390_v23  ;;  %v1432_v26 = vmul.f32 %v1176_v57, %v3394_v41  ;;  %v1192_v2 = vmul.f32 %v1943_v32, %v3546_v33  ;;  %1495 = vst [vmem:[%s2866_s16 + $0xf0] sm:$0xff] %v1431_v8  ;;  %v1181_v61 = vadd.f32 %v1941_v59, %v1180_v38  ;;  %v4226_v23 = vld [vmem:[#allocation25_spill] sm:$0xff]  ;;  %v4232_v33 = vld [vmem:[#allocation34_spill] sm:$0xff] }
 0x10e   : > { %vm1197_vm6 = vweird.f32 %v1943_v32  ;;  %1944 = vrcp.f32 %v3594_v37  ;;  %v3616_v41 = vmul.f32 %v4226_v23, %v2727_v25  ;;  %v1214_v3 = vand.u32 2147483647, %v3594_v37 }
 0x10f   : > { %1494 = vst [vmem:[%s2866_s16 + $0xe8] sm:$0xff] %v1430_v19  ;;  %v1193_v28 = vsub.f32 1.0, %v1192_v2  ;;  %v866_v22 = vadd.f32 %v865_v39, %v864_v63  ;;  %v871_v29 = vadd.f32 %v870_v62, %v869_v52  ;;  %v1185_v31 = vsel %vm3603_vm4, %v1941_v59, %v1181_v61  ;;  %vm3635_vm8 = vmor %vm1196_vm2, %vm1197_vm6  ;;  %v4234_v63 = vld [vmem:[#allocation42_spill] sm:$0xff] }
 0x110   : > { %1496 = vst [vmem:[%s2866_s16 + $0xf8] sm:$0xff] %v1432_v26  ;;  %vm1210_vm7 = vweird.f32 %v3594_v37  ;;  %v3626_v47 = vmul.f32 %v4227_v16, %v2744_v49  ;;  %v1190_v10 = vsel %vm3568_vm0, %v1189_v60, %v1185_v31  ;;  %v1216_v14 = vand.u32 2147483648, %v3594_v37 }
 0x111   : > { %v1194_v21 = vmul.f32 %v1943_v32, %v1193_v28  ;;  %v867_v35 = vrot.slane %v866_v22, 1  ;;  %v1433_v51 = vmul.f32 %v1190_v10, %v3424_v17  ;;  %v1435_v24 = vmul.f32 %v1190_v10, %v3435_v30  ;;  %v4233_v30 = vld [vmem:[#allocation35_spill] sm:$0xff] }
 0x112   : > { %v872_v56 = vrot.slane %v871_v29, 2  ;;  %v876_v50 = vadd.f32 %v3626_v47, %v3616_v41  ;;  %vm3642_vm9 = vcmp.eq.f32.partialorder %v1214_v3, 8.507059e+37  ;;  %v3650_v0 = vmul.f32 %v4232_v33, %v2940_v7  ;;  %v4241_v10 = vld [vmem:[#allocation19_spill] sm:$0xff] }
 0x113   : > { %v1195_v60 = vadd.f32 %v1943_v32, %v1194_v21  ;;  %v3646_v17 = vadd.f32 %v867_v35, %v866_v22  ;;  %1497 = vst [vmem:[%s2866_s16 + $0x100] sm:$0xff] %v1433_v51  ;;  %v3655_v46 = vmul.f32 %v4233_v30, %v2964_v1  ;;  %v3659_v34 = vmul.f32 %v4234_v63, %v3148_v12 }
 0x114   : > { %v1945_v20 = vpop.eup %1944  ;;  %v873_v4 = vadd.f32 %v872_v56, %v871_v29  ;;  %v877_v18 = vrot.slane %v876_v50, 4  ;;  %1499 = vst [vmem:[%s2866_s16 + $0x110] sm:$0xff] %v1435_v24  ;;  %v3668_v48 = vmul.f32 %v4235_v11, %v3157_v45  ;;  %v1217_v26 = vor.u32 1.1754944e-38, %v1216_v14  ;;  %v4243_v24 = vld [vmem:[#allocation28_spill] sm:$0xff] }
 0x115   : > { %v1199_v40 = vsel %vm3635_vm8, %v1943_v32, %v1195_v60  ;;  %v1206_v52 = vmul.f32 %v1945_v20, %v3594_v37  ;;  %1946 = vrcp.f32 %v3646_v17  ;;  %vm1211_vm10 = vweird.f32 %v1945_v20  ;;  %v4242_v37 = vld [vmem:[#allocation27_spill] sm:$0xff] }
 0x116   : > { %v1204_v8 = vsel %vm3608_vm5, %v1203_v27, %v1199_v40  ;;  %v1228_v57 = vand.u32 2147483647, %v3646_v17  ;;  %v1230_v38 = vand.u32 2147483648, %v3646_v17  ;;  %v874_v19 = vrot.slane %v873_v4, 1  ;;  %vm3690_vm12 = vmor %vm1210_vm7, %vm1211_vm10 }
 0x117   : > { %v1434_v32 = vmul.f32 %v1204_v8, %v3439_v43  ;;  %v1436_v39 = vmul.f32 %v1204_v8, %v3443_v44  ;;  %v1207_v62 = vsub.f32 1.0, %v1206_v52  ;;  %v878_v9 = vadd.f32 %v877_v18, %v876_v50 }
 0x118   : > { %v883_v2 = vadd.f32 %v3655_v46, %v3650_v0  ;;  %v3680_v61 = vmul.f32 %v4236_v54, %v2607_v42  ;;  %vm1224_vm11 = vweird.f32 %v3646_v17  ;;  %v875_v28 = vadd.f32 %v874_v19, %v873_v4  ;;  %v4248_v54 = vld [vmem:[#allocation36_spill] sm:$0xff] }
 0x119   : > { %1498 = vst [vmem:[%s2866_s16 + $0x108] sm:$0xff] %v1434_v32  ;;  %v1208_v23 = vmul.f32 %v1945_v20, %v1207_v62  ;;  %v890_v43 = vadd.f32 %v3668_v48, %v3659_v34  ;;  %vm3694_vm13 = vcmp.eq.f32.partialorder %v1228_v57, 8.507059e+37  ;;  %v1231_v22 = vor.u32 1.1754944e-38, %v1230_v38 }
 0x11a   : > { %1500 = vst [vmem:[%s2866_s16 + $0x118] sm:$0xff] %v1436_v39  ;;  %v879_v29 = vrot.slane %v878_v9, 2  ;;  %v884_v31 = vrot.slane %v883_v2, 4  ;;  %1948 = vrcp.f32 %v875_v28  ;;  %v3700_v21 = vmul.f32 %v4241_v10, %v2616_v53 }
 0x11b   : > { %v1947_v27 = vpop.eup %1946  ;;  %v1209_v16 = vadd.f32 %v1945_v20, %v1208_v23  ;;  %v3704_v14 = vmul.f32 %v4242_v37, %v2727_v25  ;;  %v1242_v51 = vand.u32 2147483647, %v875_v28  ;;  %v3709_v56 = vmul.f32 %v4243_v24, %v2744_v49 }
 0x11c   : > { %v1220_v35 = vmul.f32 %v1947_v27, %v3646_v17  ;;  %v880_v59 = vadd.f32 %v879_v29, %v878_v9  ;;  %v1244_v60 = vand.u32 2147483648, %v875_v28  ;;  %v885_v33 = vadd.f32 %v884_v31, %v883_v2 }
 0x11d   : > { %v1213_v50 = vsel %vm3690_vm12, %v1945_v20, %v1209_v16  ;;  %v891_v4 = vrot.slane %v890_v43, 4  ;;  %vm1225_vm14 = vweird.f32 %v1947_v27  ;;  %vm1238_vm15 = vweird.f32 %v875_v28 }
 0x11e   : > { %v1218_v18 = vsel %vm3642_vm9, %v1217_v26, %v1213_v50  ;;  %v1221_v30 = vsub.f32 1.0, %v1220_v35  ;;  %v881_v63 = vrot.slane %v880_v59, 1  ;;  %v886_v11 = vrot.slane %v885_v33, 2  ;;  %vm3724_vm0 = vmor %vm1224_vm11, %vm1225_vm14  ;;  %v4249_v35 = vld [vmem:[#allocation37_spill] sm:$0xff] }
 0x11f   : > { %v1437_v40 = vmul.f32 %v1218_v18, %v3464_v55  ;;  %v1439_v52 = vmul.f32 %v1218_v18, %v3475_v13  ;;  %v892_v8 = vadd.f32 %v891_v4, %v890_v43  ;;  %v897_v38 = vadd.f32 %v3700_v21, %v3680_v61 }
 0x120   : > { %v1222_v57 = vmul.f32 %v1947_v27, %v1221_v30  ;;  %v3717_v20 = vadd.f32 %v881_v63, %v880_v59  ;;  %v1949_v32 = vpop.eup %1948  ;;  %vm3728_vm1 = vcmp.eq.f32.partialorder %v1242_v51, 8.507059e+37  ;;  %v1245_v13 = vor.u32 1.1754944e-38, %v1244_v60 }
 0x121   : > { %1501 = vst [vmem:[%s2866_s16 + $0x120] sm:$0xff] %v1437_v40  ;;  %v887_v39 = vadd.f32 %v886_v11, %v885_v33  ;;  %v893_v62 = vrot.slane %v892_v8, 2  ;;  %v1234_v26 = vmul.f32 %v1949_v32, %v875_v28  ;;  %v904_v9 = vadd.f32 %v3709_v56, %v3704_v14 }
 0x122   : > { %v1223_v19 = vadd.f32 %v1947_v27, %v1222_v57  ;;  %1503 = vst [vmem:[%s2866_s16 + $0x130] sm:$0xff] %v1439_v52  ;;  %1950 = vrcp.f32 %v3717_v20  ;;  %vm1239_vm2 = vweird.f32 %v1949_v32  ;;  %v1256_v17 = vand.u32 2147483647, %v3717_v20 }
 0x123   : > { %v888_v2 = vrot.slane %v887_v39, 1  ;;  %v3739_v23 = vmul.f32 %v4248_v54, %v2940_v7  ;;  %v1235_v44 = vsub.f32 1.0, %v1234_v26  ;;  %v894_v29 = vadd.f32 %v893_v62, %v892_v8  ;;  %vm3756_vm3 = vmor %vm1238_vm15, %vm1239_vm2 }
 0x124   : > { %v1227_v43 = vsel %vm3724_vm0, %v1947_v27, %v1223_v19  ;;  %v898_v31 = vrot.slane %v897_v38, 4  ;;  %v1258_v10 = vand.u32 2147483648, %v3717_v20  ;;  %v3750_v51 = vmul.f32 %v4249_v35, %v2964_v1  ;;  %v4258_v35 = vld [vmem:[#allocation20_spill] sm:$0xff] }
 0x125   : > { %v1232_v16 = vsel %vm3694_vm13, %v1231_v22, %v1227_v43  ;;  %v3746_v37 = vadd.f32 %v888_v2, %v887_v39  ;;  %v1236_v24 = vmul.f32 %v1949_v32, %v1235_v44  ;;  %v895_v50 = vrot.slane %v894_v29, 1 }
 0x126   : > { %v1438_v59 = vmul.f32 %v1232_v16, %v3518_v5  ;;  %v1440_v27 = vmul.f32 %v1232_v16, %v3529_v58  ;;  %vm1252_vm4 = vweird.f32 %v3717_v20  ;;  %vm3761_vm5 = vcmp.eq.f32.partialorder %v1256_v17, 8.507059e+37 }
 0x127   : > { %1952 = vrcp.f32 %v3746_v37  ;;  %v1272_v5 = vand.u32 2147483648, %v3746_v37  ;;  %v1237_v58 = vadd.f32 %v1949_v32, %v1236_v24  ;;  %v3768_v33 = vadd.f32 %v895_v50, %v894_v29  ;;  %v4257_v29 = vld [vmem:[#allocation45_spill] sm:$0xff] }
 0x128   : > { %v1951_v60 = vpop.eup %1950  ;;  %1502 = vst [vmem:[%s2866_s16 + $0x128] sm:$0xff] %v1438_v59  ;;  %v899_v28 = vadd.f32 %v898_v31, %v897_v38  ;;  %v905_v4 = vrot.slane %v904_v9, 4  ;;  %v1259_v30 = vor.u32 1.1754944e-38, %v1258_v10  ;;  %vm1266_vm6 = vweird.f32 %v3746_v37 }
 0x129   : > { %1504 = vst [vmem:[%s2866_s16 + $0x138] sm:$0xff] %v1440_v27  ;;  %v1248_v18 = vmul.f32 %v1951_v60, %v3717_v20  ;;  %v1270_v63 = vand.u32 2147483647, %v3746_v37  ;;  %v1241_v40 = vsel %vm3756_vm3, %v1949_v32, %v1237_v58  ;;  %vm1253_vm7 = vweird.f32 %v1951_v60  ;;  %v4259_v27 = vld [vmem:[#allocation21_spill] sm:$0xff] }
 0x12a   : > { %v1273_v52 = vor.u32 1.1754944e-38, %v1272_v5  ;;  %1954 = vrcp.f32 %v3768_v33  ;;  %v1246_v11 = vsel %vm3728_vm1, %v1245_v13, %v1241_v40  ;;  %vm1280_vm8 = vweird.f32 %v3768_v33  ;;  %vm3790_vm9 = vmor %vm1252_vm4, %vm1253_vm7 }
 0x12b   : > { %v1249_v8 = vsub.f32 1.0, %v1248_v18  ;;  %v900_v57 = vrot.slane %v899_v28, 2  ;;  %v1441_v38 = vmul.f32 %v1246_v11, %v3550_v15  ;;  %v1443_v6 = vmul.f32 %v1246_v11, %v3554_v36 }
 0x12c   : > { %v1284_v39 = vand.u32 2147483647, %v3768_v33  ;;  %v906_v32 = vadd.f32 %v905_v4, %v904_v9  ;;  %v1286_v26 = vand.u32 2147483648, %v3768_v33  ;;  %v911_v55 = vadd.f32 %v3750_v51, %v3739_v23  ;;  %v4256_v9 = vld [vmem:[#allocation44_spill] sm:$0xff] }
 0x12d   : > { %v1953_v62 = vpop.eup %1952  ;;  %v1250_v19 = vmul.f32 %v1951_v60, %v1249_v8  ;;  %v901_v17 = vadd.f32 %v900_v57, %v899_v28  ;;  %1505 = vst [vmem:[%s2866_s16 + $0x140] sm:$0xff] %v1441_v38  ;;  %v3797_v2 = vmul.f32 %v4256_v9, %v3148_v12  ;;  %v3802_v31 = vmul.f32 %v4257_v29, %v3157_v45 }
 0x12e   : > { %v1262_v36 = vmul.f32 %v1953_v62, %v3746_v37  ;;  %vm1267_vm10 = vweird.f32 %v1953_v62  ;;  %v907_v13 = vrot.slane %v906_v32, 2  ;;  %1507 = vst [vmem:[%s2866_s16 + $0x150] sm:$0xff] %v1443_v6  ;;  %v912_v44 = vrot.slane %v911_v55, 4 }
 0x12f   : > { %v1251_v54 = vadd.f32 %v1951_v60, %v1250_v19  ;;  %v902_v43 = vrot.slane %v901_v17, 1  ;;  %v3806_v59 = vmul.f32 %v4258_v35, %v2607_v42  ;;  %v3810_v24 = vmul.f32 %v4259_v27, %v2616_v53  ;;  %vm3822_vm12 = vmor %vm1266_vm6, %vm1267_vm10 }
 0x130   : > { %v1955_v20 = vpop.eup %1954  ;;  %v1263_v16 = vsub.f32 1.0, %v1262_v36  ;;  %v908_v10 = vadd.f32 %v907_v13, %v906_v32  ;;  %v913_v42 = vadd.f32 %v912_v44, %v911_v55  ;;  %vm1271_vm13 = vcmp.eq.f32.partialorder %v1270_v63, 8.507059e+37 }
 0x131   : > { %v1255_v50 = vsel %vm3790_vm9, %v1951_v60, %v1251_v54  ;;  %v1276_v3 = vmul.f32 %v1955_v20, %v3768_v33  ;;  %vm1281_vm11 = vweird.f32 %v1955_v20  ;;  %v903_v5 = vadd.f32 %v902_v43, %v901_v17 }
 0x132   : > { %v1260_v58 = vsel %vm3761_vm5, %v1259_v30, %v1255_v50  ;;  %v1264_v28 = vmul.f32 %v1953_v62, %v1263_v16  ;;  %v909_v4 = vrot.slane %v908_v10, 1  ;;  %v914_v8 = vrot.slane %v913_v42, 2  ;;  %vm3837_vm14 = vmor %vm1280_vm8, %vm1281_vm11  ;;  %v4266_v16 = vld [vmem:[#allocation29_spill] sm:$0xff]  ;;  %v4267_v50 = vld [vmem:[#allocation30_spill] sm:$0xff] }
 0x133   : > { %v1442_v18 = vmul.f32 %v1260_v58, %v3616_v41  ;;  %v1444_v53 = vmul.f32 %v1260_v58, %v3626_v47  ;;  %v1277_v40 = vsub.f32 1.0, %v1276_v3  ;;  %1956 = vrcp.f32 %v903_v5  ;;  %v4269_v58 = vld [vmem:[#allocation39_spill] sm:$0xff] }
 0x134   : > { %v1265_v11 = vadd.f32 %v1953_v62, %v1264_v28  ;;  %v3827_v30 = vadd.f32 %v909_v4, %v908_v10  ;;  %v918_v41 = vadd.f32 %v3802_v31, %v3797_v2  ;;  %vm3841_vm15 = vcmp.eq.f32.partialorder %v1284_v39, 8.507059e+37 }
 0x135   : > { %1506 = vst [vmem:[%s2866_s16 + $0x148] sm:$0xff] %v1442_v18  ;;  %v1278_v22 = vmul.f32 %v1955_v20, %v1277_v40  ;;  %v1287_v57 = vor.u32 1.1754944e-38, %v1286_v26  ;;  %v925_v38 = vadd.f32 %v3810_v24, %v3806_v59  ;;  %vm1294_vm0 = vweird.f32 %v903_v5 }
 0x136   : > { %1508 = vst [vmem:[%s2866_s16 + $0x158] sm:$0xff] %v1444_v53  ;;  %v1269_v47 = vsel %vm3822_vm12, %v1953_v62, %v1265_v11  ;;  %1958 = vrcp.f32 %v3827_v30  ;;  %v1298_v19 = vand.u32 2147483647, %v903_v5  ;;  %v1300_v39 = vand.u32 2147483648, %v903_v5 }
 0x137   : > { %v1274_v6 = vsel %vm1271_vm13, %v1273_v52, %v1269_v47  ;;  %v1279_v32 = vadd.f32 %v1955_v20, %v1278_v22  ;;  %v915_v26 = vadd.f32 %v914_v8, %v913_v42  ;;  %v919_v15 = vrot.slane %v918_v41, 4 }
 0x138   : > { %v1445_v33 = vmul.f32 %v1274_v6, %v3650_v0  ;;  %v1447_v62 = vmul.f32 %v1274_v6, %v3655_v46  ;;  %v926_v36 = vrot.slane %v925_v38, 4  ;;  %v1312_v9 = vand.u32 2147483647, %v3827_v30 }
 0x139   : > { %v1957_v17 = vpop.eup %1956  ;;  %v1283_v55 = vsel %vm3837_vm14, %v1955_v20, %v1279_v32  ;;  %v1314_v0 = vand.u32 2147483648, %v3827_v30  ;;  %v916_v43 = vrot.slane %v915_v26, 1  ;;  %v920_v29 = vadd.f32 %v919_v15, %v918_v41 }
 0x13a   : > { %1509 = vst [vmem:[%s2866_s16 + $0x160] sm:$0xff] %v1445_v33  ;;  %v1288_v52 = vsel %vm3841_vm15, %v1287_v57, %v1283_v55  ;;  %v1290_v13 = vmul.f32 %v1957_v17, %v903_v5  ;;  %vm1295_vm1 = vweird.f32 %v1957_v17  ;;  %v927_v20 = vadd.f32 %v926_v36, %v925_v38 }
 0x13b   : > { %v1446_v46 = vmul.f32 %v1288_v52, %v3659_v34  ;;  %1511 = vst [vmem:[%s2866_s16 + $0x170] sm:$0xff] %v1447_v62  ;;  %v1448_v54 = vmul.f32 %v1288_v52, %v3668_v48  ;;  %v3862_v10 = vmul.f32 %v4266_v16, %v2727_v25  ;;  %v3865_v27 = vadd.f32 %v916_v43, %v915_v26  ;;  %v4268_v34 = vld [vmem:[#allocation38_spill] sm:$0xff]  ;;  %vm3887_vm3 = vmor %vm1294_vm0, %vm1295_vm1 }
 0x13c   : > { %v1291_v44 = vsub.f32 1.0, %v1290_v13  ;;  %v1959_v35 = vpop.eup %1958  ;;  %v3869_v3 = vmul.f32 %v4267_v50, %v2744_v49  ;;  %v3873_v48 = vmul.f32 %v4268_v34, %v2940_v7  ;;  %v3877_v28 = vmul.f32 %v4269_v58, %v2964_v1 }
 0x13d   : > { %1510 = vst [vmem:[%s2866_s16 + $0x168] sm:$0xff] %v1446_v46  ;;  %vm3880_vm2 = vcmp.eq.f32.partialorder %v1298_v19, 8.507059e+37  ;;  %v1304_v42 = vmul.f32 %v1959_v35, %v3827_v30  ;;  %v921_v18 = vrot.slane %v920_v29, 2  ;;  %v1301_v7 = vor.u32 1.1754944e-38, %v1300_v39 }
 0x13e   : > { %1512 = vst [vmem:[%s2866_s16 + $0x178] sm:$0xff] %v1448_v54  ;;  %v1292_v4 = vmul.f32 %v1957_v17, %v1291_v44  ;;  %vm1308_vm4 = vweird.f32 %v3827_v30  ;;  %vm1309_vm5 = vweird.f32 %v1959_v35  ;;  %1960 = vrcp.f32 %v3865_v27 }
 0x13f   : > { %v1305_v53 = vsub.f32 1.0, %v1304_v42  ;;  %v922_v60 = vadd.f32 %v921_v18, %v920_v29  ;;  %v928_v40 = vrot.slane %v927_v20, 2  ;;  %vm3893_vm6 = vcmp.eq.f32.partialorder %v1312_v9, 8.507059e+37  ;;  %vm3908_vm7 = vmor %vm1308_vm4, %vm1309_vm5 }
 0x140   : > { %v1293_v1 = vadd.f32 %v1957_v17, %v1292_v4  ;;  %v1315_v22 = vor.u32 1.1754944e-38, %v1314_v0  ;;  %v932_v5 = vadd.f32 %v3869_v3, %v3862_v10  ;;  %v939_v8 = vadd.f32 %v3877_v28, %v3873_v48  ;;  %v4279_v0 = vld [vmem:[#allocation47_spill] sm:$0xff] }
 0x141   : > { %v1306_v47 = vmul.f32 %v1959_v35, %v1305_v53  ;;  %v923_v37 = vrot.slane %v922_v60, 1  ;;  %v929_v63 = vadd.f32 %v928_v40, %v927_v20  ;;  %vm1322_vm8 = vweird.f32 %v3865_v27 }
 0x142   : > { %v1297_v41 = vsel %vm3887_vm3, %v1957_v17, %v1293_v1  ;;  %v933_v6 = vrot.slane %v932_v5, 4  ;;  %v940_v32 = vrot.slane %v939_v8, 4  ;;  %v1326_v55 = vand.u32 2147483647, %v3865_v27 }
 0x143   : > { %v1302_v57 = vsel %vm3880_vm2, %v1301_v7, %v1297_v41  ;;  %v1307_v62 = vadd.f32 %v1959_v35, %v1306_v47  ;;  %v924_v39 = vadd.f32 %v923_v37, %v922_v60  ;;  %v930_v26 = vrot.slane %v929_v63, 1 }
 0x144   : > { %v1449_v33 = vmul.f32 %v1302_v57, %v3680_v61  ;;  %v1451_v19 = vmul.f32 %v1302_v57, %v3700_v21  ;;  %v1961_v17 = vpop.eup %1960  ;;  %v934_v30 = vadd.f32 %v933_v6, %v932_v5  ;;  %v941_v15 = vadd.f32 %v940_v32, %v939_v8  ;;  %v4278_v21 = vld [vmem:[#allocation46_spill] sm:$0xff] }
 0x145   : > { %v1311_v36 = vsel %vm3908_vm7, %v1959_v35, %v1307_v62  ;;  %v1318_v52 = vmul.f32 %v1961_v17, %v3865_v27  ;;  %v1328_v13 = vand.u32 2147483648, %v3865_v27  ;;  %1962 = vrcp.f32 %v924_v39 }
 0x146   : > { %1513 = vst [vmem:[%s2866_s16 + $0x180] sm:$0xff] %v1449_v33  ;;  %v1316_v61 = vsel %vm3893_vm6, %v1315_v22, %v1311_v36  ;;  %vm1323_vm9 = vweird.f32 %v1961_v17  ;;  %v3926_v9 = vmul.f32 %v4278_v21, %v3148_v12  ;;  %v3930_v46 = vmul.f32 %v4279_v0, %v3157_v45 }
 0x147   : > { %1515 = vst [vmem:[%s2866_s16 + $0x190] sm:$0xff] %v1451_v19  ;;  %v1450_v54 = vmul.f32 %v1316_v61, %v3704_v14  ;;  %v1452_v43 = vmul.f32 %v1316_v61, %v3709_v56  ;;  %v1319_v44 = vsub.f32 1.0, %v1318_v52  ;;  %v931_v29 = vadd.f32 %v930_v26, %v929_v63  ;;  %vm3938_vm10 = vmor %vm1322_vm8, %vm1323_vm9 }
 0x148   : > { %v935_v20 = vrot.slane %v934_v30, 2  ;;  %v942_v16 = vrot.slane %v941_v15, 2  ;;  %v1329_v45 = vor.u32 1.1754944e-38, %v1328_v13  ;;  %v946_v14 = vadd.f32 %v3930_v46, %v3926_v9 }
 0x149   : > { %1514 = vst [vmem:[%s2866_s16 + $0x188] sm:$0xff] %v1450_v54  ;;  %v1320_v35 = vmul.f32 %v1961_v17, %v1319_v44  ;;  %1964 = vrcp.f32 %v931_v29  ;;  %vm1327_vm11 = vcmp.eq.f32.partialorder %v1326_v55, 8.507059e+37  ;;  %vm1336_vm12 = vweird.f32 %v924_v39 }
 0x14a   : > { %1516 = vst [vmem:[%s2866_s16 + $0x198] sm:$0xff] %v1452_v43  ;;  %v936_v50 = vadd.f32 %v935_v20, %v934_v30  ;;  %v943_v34 = vadd.f32 %v942_v16, %v941_v15  ;;  %v1340_v25 = vand.u32 2147483647, %v924_v39  ;;  %v1342_v18 = vand.u32 2147483648, %v924_v39 }
 0x14b   : > { %v1963_v56 = vpop.eup %1962  ;;  %v1321_v58 = vadd.f32 %v1961_v17, %v1320_v35  ;;  %v947_v7 = vrot.slane %v946_v14, 4  ;;  %v1354_v37 = vand.u32 2147483647, %v931_v29  ;;  %v1356_v57 = vand.u32 2147483648, %v931_v29 }
 0x14c   : > { %v1332_v4 = vmul.f32 %v1963_v56, %v924_v39  ;;  %v937_v42 = vrot.slane %v936_v50, 1  ;;  %v944_v49 = vrot.slane %v943_v34, 1  ;;  %vm1337_vm13 = vweird.f32 %v1963_v56 }
 0x14d   : > { %v1325_v27 = vsel %vm3938_vm10, %v1961_v17, %v1321_v58  ;;  %v948_v8 = vadd.f32 %v947_v7, %v946_v14  ;;  %vm1338_vm14 = vmor %vm1336_vm12, %vm1337_vm13  ;;  %vm1341_vm15 = vcmp.eq.f32.partialorder %v1340_v25, 8.507059e+37  ;;  %v1343_v63 = vor.u32 1.1754944e-38, %v1342_v18 }
 0x14e   : > { %v1330_v1 = vsel %vm1327_vm11, %v1329_v45, %v1325_v27  ;;  %v1333_v53 = vsub.f32 1.0, %v1332_v4  ;;  %v938_v60 = vadd.f32 %v937_v42, %v936_v50  ;;  %v945_v5 = vadd.f32 %v944_v49, %v943_v34 }
 0x14f   : > { %v1965_v40 = vpop.eup %1964  ;;  %v1453_v11 = vmul.f32 %v1330_v1, %v3739_v23  ;;  %v1455_v22 = vmul.f32 %v1330_v1, %v3750_v51  ;;  %vm1350_vm0 = vweird.f32 %v931_v29  ;;  %v949_v23 = vrot.slane %v948_v8, 2 }
 0x150   : > { %v1334_v41 = vmul.f32 %v1963_v56, %v1333_v53  ;;  %v1346_v47 = vmul.f32 %v1965_v40, %v931_v29  ;;  %1966 = vrcp.f32 %v938_v60  ;;  %vm1351_vm1 = vweird.f32 %v1965_v40 }
 0x151   : > { %1517 = vst [vmem:[%s2866_s16 + $0x1a0] sm:$0xff] %v1453_v11  ;;  %1968 = vrcp.f32 %v945_v5  ;;  %vm3951_vm2 = vcmp.eq.f32.partialorder %v1354_v37, 8.507059e+37  ;;  %vm3955_vm3 = vmor %vm1350_vm0, %vm1351_vm1  ;;  %v1357_v39 = vor.u32 1.1754944e-38, %v1356_v57  ;;  %vm1364_vm4 = vweird.f32 %v938_v60 }
 0x152   : > { %v1335_v38 = vadd.f32 %v1963_v56, %v1334_v41  ;;  %1519 = vst [vmem:[%s2866_s16 + $0x1b0] sm:$0xff] %v1455_v22  ;;  %v1347_v6 = vsub.f32 1.0, %v1346_v47  ;;  %v950_v17 = vadd.f32 %v949_v23, %v948_v8  ;;  %v1368_v36 = vand.u32 2147483647, %v938_v60 }
 0x153   : > { %v1370_v61 = vand.u32 2147483648, %v938_v60  ;;  %vm1378_vm5 = vweird.f32 %v945_v5  ;;  %v1382_v43 = vand.u32 2147483647, %v945_v5  ;;  %v1384_v44 = vand.u32 2147483648, %v945_v5 }
 0x154   : > { %v1339_v51 = vsel %vm1338_vm14, %v1963_v56, %v1335_v38  ;;  %v1348_v32 = vmul.f32 %v1965_v40, %v1347_v6  ;;  %v951_v21 = vrot.slane %v950_v17, 1  ;;  %vm1369_vm9 = vcmp.eq.f32.partialorder %v1368_v36, 8.507059e+37 }
 0x155   : > { %v1344_v62 = vsel %vm1341_vm15, %v1343_v63, %v1339_v51  ;;  %v1371_v45 = vor.u32 1.1754944e-38, %v1370_v61  ;;  %v1385_v14 = vor.u32 1.1754944e-38, %v1384_v44  ;;  %vm1383_vm11 = vcmp.eq.f32.partialorder %v1382_v43, 8.507059e+37 }
 0x156   : > { %v1967_v55 = vpop.eup %1966  ;;  %v1454_v26 = vmul.f32 %v1344_v62, %v3797_v2  ;;  %v1456_v30 = vmul.f32 %v1344_v62, %v3802_v31  ;;  %v1349_v15 = vadd.f32 %v1965_v40, %v1348_v32  ;;  %v952_v29 = vadd.f32 %v951_v21, %v950_v17 }
 0x157   : > { %v1969_v52 = vpop.eup %1968  ;;  %v1360_v13 = vmul.f32 %v1967_v55, %v938_v60  ;;  %vm1365_vm6 = vweird.f32 %v1967_v55 }
 0x158   : > { %1518 = vst [vmem:[%s2866_s16 + $0x1a8] sm:$0xff] %v1454_v26  ;;  %v1353_v0 = vsel %vm3955_vm3, %v1965_v40, %v1349_v15  ;;  %v1374_v54 = vmul.f32 %v1969_v52, %v945_v5  ;;  %vm1379_vm7 = vweird.f32 %v1969_v52  ;;  %1970 = vrcp.f32 %v952_v29  ;;  %vm1366_vm8 = vmor %vm1364_vm4, %vm1365_vm6 }
 0x159   : > { %1520 = vst [vmem:[%s2866_s16 + $0x1b8] sm:$0xff] %v1456_v30  ;;  %v1358_v2 = vsel %vm3951_vm2, %v1357_v39, %v1353_v0  ;;  %v1361_v31 = vsub.f32 1.0, %v1360_v13  ;;  %vm1380_vm10 = vmor %vm1378_vm5, %vm1379_vm7  ;;  %v1398_v1 = vand.u32 2147483648, %v952_v29  ;;  %vm1392_vm12 = vweird.f32 %v952_v29 }
 0x15a   : > { %v1457_v20 = vmul.f32 %v1358_v2, %v3806_v59  ;;  %v1459_v16 = vmul.f32 %v1358_v2, %v3810_v24  ;;  %v1375_v35 = vsub.f32 1.0, %v1374_v54  ;;  %v1396_v60 = vand.u32 2147483647, %v952_v29 }
 0x15b   : > { %v1362_v12 = vmul.f32 %v1967_v55, %v1361_v31 }
 0x15c   : > { %1521 = vst [vmem:[%s2866_s16 + $0x1c0] sm:$0xff] %v1457_v20  ;;  %v1376_v50 = vmul.f32 %v1969_v52, %v1375_v35  ;;  %vm1397_vm15 = vcmp.eq.f32.partialorder %v1396_v60, 8.507059e+37 }
 0x15d   : > { %v1363_v34 = vadd.f32 %v1967_v55, %v1362_v12  ;;  %1523 = vst [vmem:[%s2866_s16 + $0x1d0] sm:$0xff] %v1459_v16 }
 0x15e   : > { %v1377_v59 = vadd.f32 %v1969_v52, %v1376_v50  ;;  %v1971_v4 = vpop.eup %1970 }
 0x15f   : > { %v1367_v24 = vsel %vm1366_vm8, %v1967_v55, %v1363_v34  ;;  %v1388_v49 = vmul.f32 %v1971_v4, %v952_v29  ;;  %vm1393_vm13 = vweird.f32 %v1971_v4 }
 0x160   : > { %v1372_v56 = vsel %vm1369_vm9, %v1371_v45, %v1367_v24  ;;  %v1381_v58 = vsel %vm1380_vm10, %v1969_v52, %v1377_v59  ;;  %vm1394_vm14 = vmor %vm1392_vm12, %vm1393_vm13 }
 0x161   : > { %v1458_v25 = vmul.f32 %v1372_v56, %v3862_v10  ;;  %v1460_v42 = vmul.f32 %v1372_v56, %v3869_v3  ;;  %v1386_v27 = vsel %vm1383_vm11, %v1385_v14, %v1381_v58  ;;  %v1389_v53 = vsub.f32 1.0, %v1388_v49 }
 0x162   : > { %v1461_v18 = vmul.f32 %v1386_v27, %v3873_v48  ;;  %v1463_v7 = vmul.f32 %v1386_v27, %v3877_v28  ;;  %v1399_v3 = vor.u32 1.1754944e-38, %v1398_v1 }
 0x163   : > { %1522 = vst [vmem:[%s2866_s16 + $0x1c8] sm:$0xff] %v1458_v25  ;;  %v1390_v10 = vmul.f32 %v1971_v4, %v1389_v53 }
 0x164   : > { %1524 = vst [vmem:[%s2866_s16 + $0x1d8] sm:$0xff] %v1460_v42 }
 0x165   : > { %1525 = vst [vmem:[%s2866_s16 + $0x1e0] sm:$0xff] %v1461_v18  ;;  %v1391_v40 = vadd.f32 %v1971_v4, %v1390_v10 }
 0x166   : > { %1527 = vst [vmem:[%s2866_s16 + $0x1f0] sm:$0xff] %v1463_v7 }
 0x167   : > { %v1395_v48 = vsel %vm1394_vm14, %v1971_v4, %v1391_v40 }
 0x168   : > { %v1400_v11 = vsel %vm1397_vm15, %v1399_v3, %v1395_v48 }
 0x169   : > { %v1462_v28 = vmul.f32 %v1400_v11, %v3926_v9  ;;  %v1464_v22 = vmul.f32 %v1400_v11, %v3930_v46 }
 0x16b   : > { %1526 = vst [vmem:[%s2866_s16 + $0x1e8] sm:$0xff] %v1462_v28 }
 0x16c   : > { %1528 = vst [vmem:[%s2866_s16 + $0x1f8] sm:$0xff] %v1464_v22 }
 0x16d   : > { %s1680_s29 = sshll.u32 %s2018_s9, 6  ;;  %s1555_s30 = sshll.u32 %s2866_s16, 4  ;;  %s1556_s30 = int_to_ptr.vmem [resolvable:$true] %s1555_s30 }
 0x16e   : > { %s1544_s4 = scalar_lea.hbm %s4029_s1, %s1680_s29  ;;  %s2034_s12 = smov 1024  }
 0x16f   : > { %s1557_s5 = sshll.u32 %s1544_s4, 4  ;;  %1690 = sst [smem:[#allocation9]] (%p2102_p9), %s2034_s12  ;;  %s1558_s5 = int_to_ptr.hbm [resolvable:$true] %s1557_s5 }
 0x170   : > { %s2035_s13 = smov 2048   ;;  %s2036_s15 = smov 4  }
 0x171   : > { %1691 = sst [smem:[#allocation9 + $0x1]] (%p2102_p9), %s2035_s13  ;;  %s2037_s9 = smov 256  }
 0x172   : > { %1692 = sst [smem:[#allocation9 + $0x2]] (%p2102_p9), %s2036_s15  ;;  %s2038_s17 = smov 16  }
 0x173   : > { %1693 = sst [smem:[#allocation9 + $0x3]] (%p2102_p9), %s2037_s9  ;;  %s2039_s23 = smov [#allocation8]  }
 0x174   : > { %1694 = sst [smem:[#allocation9 + $0x4]] (%p2102_p9), %s2037_s9  ;;  %s2040_s24 = smov 0  }
 0x175   : > { %1695 = sst [smem:[#allocation9 + $0x5]] (%p2102_p9), %s2038_s17 }
 0x176   : > { %1696 = dma.general (%p2102_p9), %s1556_s30, 8192, %s1558_s5, %s1530_s18, %s2039_s23, [#allocation9], %s2040_s24, 0  }
 0x177 PF: > { %s1585_s25 = sand.u32 1, %s2006_s6   ;;  %p1699_p2 = pnand %p1661_p12, %p2109_p11 }
 0x178   : > { %s1586_s26 = scalar_lea.sflag [#allocation4], %s1585_s25 }
 0x179   : > { %p1700_p3 = pneg %p1699_p2 }
 0x17b   : > { %2001 = dma.done.wait (%p1700_p3), %s1586_s26, 8192  }
 0x17c   : > { %2003 = vsyncadd (%p1700_p3), %s1586_s26, 4294959104  ;;  %s17_s11 = sadd.s32 1, %s2026_s11   ;;  %s4286_s6 = smov %s2010_s7 }
 0x17d   : > { %p14_p4 = scmp.ge.s32.totalorder %s17_s11, 4   ;;  %s4287_s7 = smov %s2014_s8 }
 0x17e   : > { %s4288_s8 = smov %s2107_s20  ;;  %s4289_s9 = smov %s2022_s10 }
 0x17f   : > { %s4290_s10 = smov %s4292_s14  ;;  %16 = sbr.rel (!%p14_p4) target bundleno = 6 (0x6), region = 79 }
 0x184   :  { %1592 = vsyncpa [#allocation3], 1 }
 0x185   :  { %1594 = vsyncpa [#allocation3 + $0x1], 1 }
 0x186   :  { %1595 = vsyncpa [#allocation4], 1 }
 0x187   :  { %1597 = vsyncpa [#allocation4 + $0x1], 1 }

</bundles_post_ra>
